<compile_context>
chip_gen: v7x
topology: tpu7x:2x2x1
jax: 0.10.0
libtpu: 0.0.40
codegen_flags: <defaults>
</compile_context>

<pallas_src>
import jax
import jax.numpy as jnp
from jax import lax
from jax.experimental import pallas as pl
from jax.experimental.pallas import tpu as pltpu

INPUT_SIZE = 28
HIDDEN = 64
NUM_CLASSES = 10
HP = 128            # hidden padded to one full 128-lane vreg
GP = 4 * HP         # padded gate width: [i | f | g | o], 128 lanes each


def _round_up(n, m):
    return ((n + m - 1) // m) * m


def lstm_chunk_kernel(pre_ref, w_hh_ref, w_out_ref, b_out_ref, out_ref,
                      h_scr, c_scr):
    """One LSTM time-chunk per grid step for one batch block.

    pre_ref   : (Tc, Bc, 4*HP)  precomputed x@W_ih^T + (b_ih+b_hh), gate-padded
    w_hh_ref  : (HP, 4*HP)      hidden->gates weights (padded)
    w_out_ref : (HP, HP)        Linear head weights (padded; cols >= 10 zero)
    b_out_ref : (1, HP)         Linear head bias (padded)
    out_ref   : (Bc, HP)        padded logits, written on the last time chunk
    h_scr/c_scr : (Bc, HP)      recurrent state, persistent VMEM scratch
    """
    t = pl.program_id(1)

    @pl.when(t == 0)
    def _init():
        h_scr[...] = jnp.zeros_like(h_scr)
        c_scr[...] = jnp.zeros_like(c_scr)

    w_hh = w_hh_ref[...]          # hoisted: loaded once per chunk
    tc = pre_ref.shape[0]         # static chunk length

    def step(j, carry):
        h, c = carry
        # Only the recurrent matmul sits on the serial critical path.
        gates = pre_ref[j] + jnp.dot(h, w_hh, preferred_element_type=jnp.float32)
        # 128-lane (whole-vreg) gate slices -> no cross-lane extraction.
        i_g = jax.nn.sigmoid(gates[:, 0 * HP:1 * HP])
        f_g = jax.nn.sigmoid(gates[:, 1 * HP:2 * HP])
        g_g = jnp.tanh(gates[:, 2 * HP:3 * HP])
        o_g = jax.nn.sigmoid(gates[:, 3 * HP:4 * HP])
        c_new = f_g * c + i_g * g_g
        h_new = o_g * jnp.tanh(c_new)
        return h_new, c_new

    h_fin, c_fin = lax.fori_loop(0, tc, step, (h_scr[...], c_scr[...]),
                                 unroll=True)
    h_scr[...] = h_fin
    c_scr[...] = c_fin

    @pl.when(t == pl.num_programs(1) - 1)
    def _final():
        out_ref[...] = (jnp.dot(h_fin, w_out_ref[...],
                                preferred_element_type=jnp.float32)
                        + b_out_ref[...])


def rnn_forward(x, params, *, t_chunk_max=16, b_block_max=128):
    """x: (B, T, INPUT_SIZE) float32 -> logits (B, NUM_CLASSES) float32."""
    w_ih, w_hh, b_ih, b_hh, w_out, b_out = params
    B, T, I = x.shape
    assert I == INPUT_SIZE
    assert b_block_max % 8 == 0

    # ---- parameter prep: pad each 64-wide gate block to 128 lanes (zeros) ----
    def gate_pad(w_t):                                   # w_t: (K, 4*HIDDEN)
        k = w_t.shape[0]
        w3 = w_t.reshape(k, 4, HIDDEN)
        w3 = jnp.pad(w3, ((0, 0), (0, 0), (0, HP - HIDDEN)))
        return w3.reshape(k, GP)

    w_ih_p = gate_pad(w_ih.T)                                         # (I, 4HP)
    w_hh_p = jnp.pad(gate_pad(w_hh.T), ((0, HP - HIDDEN), (0, 0)))    # (HP, 4HP)
    b_p = jnp.pad((b_ih + b_hh).reshape(4, HIDDEN),
                  ((0, 0), (0, HP - HIDDEN))).reshape(GP)             # (4HP,)
    w_out_p = jnp.pad(w_out.T, ((0, HP - HIDDEN), (0, HP - NUM_CLASSES)))  # (HP,HP)
    b_out_p = jnp.pad(b_out, (0, HP - NUM_CLASSES))[None, :]          # (1, HP)

    # ---- batch / time padding & blocking ----
    b8 = _round_up(B, 8)              # sublane multiple
    bc = min(b8, b_block_max)         # batch block (parallel grid axis)
    b_pad = _round_up(b8, bc)
    tc = min(T, t_chunk_max)          # time chunk run inside one grid step
    t_pad = _round_up(T, tc)

    x_p = jnp.pad(x, ((0, b_pad - B), (0, 0), (0, 0)))

    # ---- hoisted input projection: one large GEMM for all timesteps, with the
    # (B,T,I) -> (T,B,4HP) transpose folded in; completely off the serial path.
    preact = jnp.einsum('bti,ig->tbg', x_p, w_ih_p) + b_p      # (T, b_pad, 4HP)
    if t_pad > T:
        # Leading zero-preactivation steps are exact no-ops on the zero state
        # (sigmoid(0)*0 + sigmoid(0)*tanh(0) == 0), so pad at the FRONT.
        preact = jnp.concatenate(
            [jnp.zeros((t_pad - T, b_pad, GP), preact.dtype), preact], axis=0)

    grid = (b_pad // bc, t_pad // tc)

    out_pad = pl.pallas_call(
        lstm_chunk_kernel,
        out_shape=jax.ShapeDtypeStruct((b_pad, HP), jnp.float32),
        grid_spec=pltpu.PrefetchScalarGridSpec(
            num_scalar_prefetch=0,
            grid=grid,
            in_specs=[
                pl.BlockSpec((tc, bc, GP), lambda b, t: (t, b, 0)),
                pl.BlockSpec((HP, GP), lambda b, t: (0, 0)),
                pl.BlockSpec((HP, HP), lambda b, t: (0, 0)),
                pl.BlockSpec((1, HP), lambda b, t: (0, 0)),
            ],
            out_specs=pl.BlockSpec((bc, HP), lambda b, t: (b, 0)),
            scratch_shapes=[
                pltpu.VMEM((bc, HP), jnp.float32),   # h
                pltpu.VMEM((bc, HP), jnp.float32),   # c
            ],
        ),
        compiler_params=pltpu.CompilerParams(
            # batch blocks independent (megacore / v7x 2 TCs); time sequential.
            dimension_semantics=("parallel", "arbitrary"),
        ),
    )(preact, w_hh_p, w_out_p, b_out_p)

    return out_pad[:B, :NUM_CLASSES]


def init_params(key):
    """Deterministic parameter init matching PyTorch shapes (uniform +-1/sqrt(H))."""
    ks = jax.random.split(key, 6)
    bound = 1.0 / jnp.sqrt(jnp.float32(HIDDEN))
    u = lambda k, shape: jax.random.uniform(k, shape, jnp.float32, -bound, bound)
    w_ih = u(ks[0], (4 * HIDDEN, INPUT_SIZE))   # weight_ih_l0
    w_hh = u(ks[1], (4 * HIDDEN, HIDDEN))       # weight_hh_l0
    b_ih = u(ks[2], (4 * HIDDEN,))              # bias_ih_l0
    b_hh = u(ks[3], (4 * HIDDEN,))              # bias_hh_l0
    w_out = u(ks[4], (NUM_CLASSES, HIDDEN))     # out.weight
    b_out = u(ks[5], (NUM_CLASSES,))            # out.bias
    return (w_ih, w_hh, b_ih, b_hh, w_out, b_out)


def rnn_forward_ref(x, params):
    """Pure-JAX reference (lax.scan LSTM) for validation."""
    w_ih, w_hh, b_ih, b_hh, w_out, b_out = params
    B = x.shape[0]
    h0 = jnp.zeros((B, HIDDEN), jnp.float32)
    c0 = jnp.zeros((B, HIDDEN), jnp.float32)

    def step(carry, x_t):
        h, c = carry
        gates = x_t @ w_ih.T + h @ w_hh.T + b_ih + b_hh
        i = jax.nn.sigmoid(gates[:, 0 * HIDDEN:1 * HIDDEN])
        f = jax.nn.sigmoid(gates[:, 1 * HIDDEN:2 * HIDDEN])
        g = jnp.tanh(gates[:, 2 * HIDDEN:3 * HIDDEN])
        o = jax.nn.sigmoid(gates[:, 3 * HIDDEN:4 * HIDDEN])
        c_new = f * c + i * g
        h_new = o * jnp.tanh(c_new)
        return (h_new, c_new), None

    (h_last, _), _ = jax.lax.scan(step, (h0, c0), jnp.transpose(x, (1, 0, 2)))
    return h_last @ w_out.T + b_out


if __name__ == "__main__":
    key = jax.random.PRNGKey(0)
    k_x, k_p = jax.random.split(key)
    params = init_params(k_p)

    # Primary small test (matches the module scale): B=2, T=8, I=28.
    B, T = 2, 8
    x = jax.random.normal(k_x, (B, T, INPUT_SIZE), jnp.float32)
    logits = jax.block_until_ready(rnn_forward(x, params))
    ref = jax.block_until_ready(rnn_forward_ref(x, params))
    assert logits.shape == (B, NUM_CLASSES)
    assert jnp.max(jnp.abs(logits - ref)) < 2e-4, "mismatch vs pure-JAX reference"

    # Second test exercising batch blocking, time chunking and front padding.
    x2 = jax.random.normal(jax.random.PRNGKey(1), (12, 21, INPUT_SIZE), jnp.float32)
    logits2 = jax.block_until_ready(
        rnn_forward(x2, params, t_chunk_max=8, b_block_max=8))
    ref2 = jax.block_until_ready(rnn_forward_ref(x2, params))
    assert jnp.max(jnp.abs(logits2 - ref2)) < 2e-4, "mismatch (chunked path)"

    print("KERNEL_OK")
</pallas_src>

<mosaic_0001>
module attributes {stable_mosaic.version = 11 : i64} {
  func.func @lstm_chunk_kernel(%arg0: i32, %arg1: i32, %arg2: memref<8x8x512xf32, #tpu.memory_space<vmem>>, %arg3: memref<128x512xf32, #tpu.memory_space<vmem>>, %arg4: memref<128x128xf32, #tpu.memory_space<vmem>>, %arg5: memref<1x128xf32, #tpu.memory_space<vmem>>, %arg6: memref<8x128xf32, #tpu.memory_space<vmem>>, %arg7: memref<8x128xf32, #tpu.memory_space<vmem>>, %arg8: memref<8x128xf32, #tpu.memory_space<vmem>>) attributes {dimension_semantics = [#tpu.dimension_semantics<parallel>, #tpu.dimension_semantics<arbitrary>], iteration_bounds = array<i64: 1, 1>, scalar_prefetch = 0 : i64, scratch_operands = 2 : i64, tpu.core_type = #tpu.core_type<tc>, window_params = [{transform_indices = @transform_0, window_bounds = array<i64: 8, 8, 512>}, {pipeline_mode = #tpu.pipeline_mode<synchronous>, transform_indices = @transform_1, window_bounds = array<i64: 128, 512>}, {pipeline_mode = #tpu.pipeline_mode<synchronous>, transform_indices = @transform_2, window_bounds = array<i64: 128, 128>}, {pipeline_mode = #tpu.pipeline_mode<synchronous>, transform_indices = @transform_3, window_bounds = array<i64: 1, 128>}, {transform_indices = @transform_4, window_bounds = array<i64: 8, 128>}]} {
    %c0_i32 = arith.constant 0 : i32
    %0 = arith.cmpi eq, %arg1, %c0_i32 : i32
    %1 = arith.extui %0 : i1 to i32
    %c0_i32_0 = arith.constant 0 : i32
    %2 = arith.cmpi ne, %1, %c0_i32_0 : i32
    scf.if %2 {
      %cst_60 = arith.constant 0.000000e+00 : f32
      %251 = vector.broadcast %cst_60 : f32 to vector<8x128xf32>
      %c0_61 = arith.constant 0 : index
      %c0_62 = arith.constant 0 : index
      %252 = vector.load %arg7[%c0_61, %c0_62] : memref<8x128xf32, #tpu.memory_space<vmem>>, vector<8x128xf32>
      tpu.vector_store %arg7[%c0_61, %c0_62], %251 {strides = array<i32>} : memref<8x128xf32, #tpu.memory_space<vmem>>, vector<8x128xf32>,
      %cst_63 = arith.constant 0.000000e+00 : f32
      %253 = vector.broadcast %cst_63 : f32 to vector<8x128xf32>
      %c0_64 = arith.constant 0 : index
      %c0_65 = arith.constant 0 : index
      %254 = vector.load %arg8[%c0_64, %c0_65] : memref<8x128xf32, #tpu.memory_space<vmem>>, vector<8x128xf32>
      tpu.vector_store %arg8[%c0_64, %c0_65], %253 {strides = array<i32>} : memref<8x128xf32, #tpu.memory_space<vmem>>, vector<8x128xf32>,
    } else {
    }
    %c0 = arith.constant 0 : index
    %c0_1 = arith.constant 0 : index
    %3 = vector.load %arg3[%c0, %c0_1] : memref<128x512xf32, #tpu.memory_space<vmem>>, vector<128x512xf32>
    %c0_2 = arith.constant 0 : index
    %c0_3 = arith.constant 0 : index
    %4 = vector.load %arg7[%c0_2, %c0_3] : memref<8x128xf32, #tpu.memory_space<vmem>>, vector<8x128xf32>
    %c0_4 = arith.constant 0 : index
    %c0_5 = arith.constant 0 : index
    %5 = vector.load %arg8[%c0_4, %c0_5] : memref<8x128xf32, #tpu.memory_space<vmem>>, vector<8x128xf32>
    %c0_i32_6 = arith.constant 0 : i32
    %6 = arith.index_cast %c0_i32_6 : i32 to index
    %c0_7 = arith.constant 0 : index
    %c0_8 = arith.constant 0 : index
    %7 = vector.load %arg2[%6, %c0_7, %c0_8] : memref<8x8x512xf32, #tpu.memory_space<vmem>>, vector<1x8x512xf32>
    %8 = vector.shape_cast %7 : vector<1x8x512xf32> to vector<8x512xf32>
    %cst = arith.constant dense<0.000000e+00> : vector<8x512xf32>
    %9 = tpu.matmul %4, %3, %cst {dimension_numbers = #tpu.dot_dimension_numbers<[1], [0], [0], [1], [0, 0, 1, 1], [], []>} : vector<8x128xf32>, vector<128x512xf32>, vector<8x512xf32> -> vector<8x512xf32>
    %10 = arith.addf %8, %9 : vector<8x512xf32>
    %11 = vector.extract_strided_slice %10 {offsets = [0, 0], sizes = [8, 128], strides = [1, 1]} : vector<8x512xf32> to vector<8x128xf32>
    %12 = arith.negf %11 : vector<8x128xf32>
    %13 = math.exp %12 : vector<8x128xf32>
    %cst_9 = arith.constant 1.000000e+00 : f32
    %14 = vector.broadcast %cst_9 : f32 to vector<8x128xf32>
    %15 = arith.addf %14, %13 : vector<8x128xf32>
    %16 = arith.divf %14, %15 : vector<8x128xf32>
    %17 = vector.extract_strided_slice %10 {offsets = [0, 128], sizes = [8, 128], strides = [1, 1]} : vector<8x512xf32> to vector<8x128xf32>
    %18 = arith.negf %17 : vector<8x128xf32>
    %19 = math.exp %18 : vector<8x128xf32>
    %cst_10 = arith.constant 1.000000e+00 : f32
    %20 = vector.broadcast %cst_10 : f32 to vector<8x128xf32>
    %21 = arith.addf %20, %19 : vector<8x128xf32>
    %22 = arith.divf %20, %21 : vector<8x128xf32>
    %23 = vector.extract_strided_slice %10 {offsets = [0, 256], sizes = [8, 128], strides = [1, 1]} : vector<8x512xf32> to vector<8x128xf32>
    %24 = math.tanh %23 : vector<8x128xf32>
    %25 = vector.extract_strided_slice %10 {offsets = [0, 384], sizes = [8, 128], strides = [1, 1]} : vector<8x512xf32> to vector<8x128xf32>
    %26 = arith.negf %25 : vector<8x128xf32>
    %27 = math.exp %26 : vector<8x128xf32>
    %cst_11 = arith.constant 1.000000e+00 : f32
    %28 = vector.broadcast %cst_11 : f32 to vector<8x128xf32>
    %29 = arith.addf %28, %27 : vector<8x128xf32>
    %30 = arith.divf %28, %29 : vector<8x128xf32>
    %31 = arith.mulf %22, %5 : vector<8x128xf32>
    %32 = arith.mulf %16, %24 : vector<8x128xf32>
    %33 = arith.addf %31, %32 : vector<8x128xf32>
    %34 = math.tanh %33 : vector<8x128xf32>
    %35 = arith.mulf %30, %34 : vector<8x128xf32>
    %c1_i32 = arith.constant 1 : i32
    %36 = arith.index_cast %c1_i32 : i32 to index
    %c0_12 = arith.constant 0 : index
    %c0_13 = arith.constant 0 : index
    %37 = vector.load %arg2[%36, %c0_12, %c0_13] : memref<8x8x512xf32, #tpu.memory_space<vmem>>, vector<1x8x512xf32>
    %38 = vector.shape_cast %37 : vector<1x8x512xf32> to vector<8x512xf32>
    %cst_14 = arith.constant dense<0.000000e+00> : vector<8x512xf32>
    %39 = tpu.matmul %35, %3, %cst_14 {dimension_numbers = #tpu.dot_dimension_numbers<[1], [0], [0], [1], [0, 0, 1, 1], [], []>} : vector<8x128xf32>, vector<128x512xf32>, vector<8x512xf32> -> vector<8x512xf32>
    %40 = arith.addf %38, %39 : vector<8x512xf32>
    %41 = vector.extract_strided_slice %40 {offsets = [0, 0], sizes = [8, 128], strides = [1, 1]} : vector<8x512xf32> to vector<8x128xf32>
    %42 = arith.negf %41 : vector<8x128xf32>
    %43 = math.exp %42 : vector<8x128xf32>
    %cst_15 = arith.constant 1.000000e+00 : f32
    %44 = vector.broadcast %cst_15 : f32 to vector<8x128xf32>
    %45 = arith.addf %44, %43 : vector<8x128xf32>
    %46 = arith.divf %44, %45 : vector<8x128xf32>
    %47 = vector.extract_strided_slice %40 {offsets = [0, 128], sizes = [8, 128], strides = [1, 1]} : vector<8x512xf32> to vector<8x128xf32>
    %48 = arith.negf %47 : vector<8x128xf32>
    %49 = math.exp %48 : vector<8x128xf32>
    %cst_16 = arith.constant 1.000000e+00 : f32
    %50 = vector.broadcast %cst_16 : f32 to vector<8x128xf32>
    %51 = arith.addf %50, %49 : vector<8x128xf32>
    %52 = arith.divf %50, %51 : vector<8x128xf32>
    %53 = vector.extract_strided_slice %40 {offsets = [0, 256], sizes = [8, 128], strides = [1, 1]} : vector<8x512xf32> to vector<8x128xf32>
    %54 = math.tanh %53 : vector<8x128xf32>
    %55 = vector.extract_strided_slice %40 {offsets = [0, 384], sizes = [8, 128], strides = [1, 1]} : vector<8x512xf32> to vector<8x128xf32>
    %56 = arith.negf %55 : vector<8x128xf32>
    %57 = math.exp %56 : vector<8x128xf32>
    %cst_17 = arith.constant 1.000000e+00 : f32
    %58 = vector.broadcast %cst_17 : f32 to vector<8x128xf32>
    %59 = arith.addf %58, %57 : vector<8x128xf32>
    %60 = arith.divf %58, %59 : vector<8x128xf32>
    %61 = arith.mulf %52, %33 : vector<8x128xf32>
    %62 = arith.mulf %46, %54 : vector<8x128xf32>
    %63 = arith.addf %61, %62 : vector<8x128xf32>
    %64 = math.tanh %63 : vector<8x128xf32>
    %65 = arith.mulf %60, %64 : vector<8x128xf32>
    %c2_i32 = arith.constant 2 : i32
    %66 = arith.index_cast %c2_i32 : i32 to index
    %c0_18 = arith.constant 0 : index
    %c0_19 = arith.constant 0 : index
    %67 = vector.load %arg2[%66, %c0_18, %c0_19] : memref<8x8x512xf32, #tpu.memory_space<vmem>>, vector<1x8x512xf32>
    %68 = vector.shape_cast %67 : vector<1x8x512xf32> to vector<8x512xf32>
    %cst_20 = arith.constant dense<0.000000e+00> : vector<8x512xf32>
    %69 = tpu.matmul %65, %3, %cst_20 {dimension_numbers = #tpu.dot_dimension_numbers<[1], [0], [0], [1], [0, 0, 1, 1], [], []>} : vector<8x128xf32>, vector<128x512xf32>, vector<8x512xf32> -> vector<8x512xf32>
    %70 = arith.addf %68, %69 : vector<8x512xf32>
    %71 = vector.extract_strided_slice %70 {offsets = [0, 0], sizes = [8, 128], strides = [1, 1]} : vector<8x512xf32> to vector<8x128xf32>
    %72 = arith.negf %71 : vector<8x128xf32>
    %73 = math.exp %72 : vector<8x128xf32>
    %cst_21 = arith.constant 1.000000e+00 : f32
    %74 = vector.broadcast %cst_21 : f32 to vector<8x128xf32>
    %75 = arith.addf %74, %73 : vector<8x128xf32>
    %76 = arith.divf %74, %75 : vector<8x128xf32>
    %77 = vector.extract_strided_slice %70 {offsets = [0, 128], sizes = [8, 128], strides = [1, 1]} : vector<8x512xf32> to vector<8x128xf32>
    %78 = arith.negf %77 : vector<8x128xf32>
    %79 = math.exp %78 : vector<8x128xf32>
    %cst_22 = arith.constant 1.000000e+00 : f32
    %80 = vector.broadcast %cst_22 : f32 to vector<8x128xf32>
    %81 = arith.addf %80, %79 : vector<8x128xf32>
    %82 = arith.divf %80, %81 : vector<8x128xf32>
    %83 = vector.extract_strided_slice %70 {offsets = [0, 256], sizes = [8, 128], strides = [1, 1]} : vector<8x512xf32> to vector<8x128xf32>
    %84 = math.tanh %83 : vector<8x128xf32>
    %85 = vector.extract_strided_slice %70 {offsets = [0, 384], sizes = [8, 128], strides = [1, 1]} : vector<8x512xf32> to vector<8x128xf32>
    %86 = arith.negf %85 : vector<8x128xf32>
    %87 = math.exp %86 : vector<8x128xf32>
    %cst_23 = arith.constant 1.000000e+00 : f32
    %88 = vector.broadcast %cst_23 : f32 to vector<8x128xf32>
    %89 = arith.addf %88, %87 : vector<8x128xf32>
    %90 = arith.divf %88, %89 : vector<8x128xf32>
    %91 = arith.mulf %82, %63 : vector<8x128xf32>
    %92 = arith.mulf %76, %84 : vector<8x128xf32>
    %93 = arith.addf %91, %92 : vector<8x128xf32>
    %94 = math.tanh %93 : vector<8x128xf32>
    %95 = arith.mulf %90, %94 : vector<8x128xf32>
    %c3_i32 = arith.constant 3 : i32
    %96 = arith.index_cast %c3_i32 : i32 to index
    %c0_24 = arith.constant 0 : index
    %c0_25 = arith.constant 0 : index
    %97 = vector.load %arg2[%96, %c0_24, %c0_25] : memref<8x8x512xf32, #tpu.memory_space<vmem>>, vector<1x8x512xf32>
    %98 = vector.shape_cast %97 : vector<1x8x512xf32> to vector<8x512xf32>
    %cst_26 = arith.constant dense<0.000000e+00> : vector<8x512xf32>
    %99 = tpu.matmul %95, %3, %cst_26 {dimension_numbers = #tpu.dot_dimension_numbers<[1], [0], [0], [1], [0, 0, 1, 1], [], []>} : vector<8x128xf32>, vector<128x512xf32>, vector<8x512xf32> -> vector<8x512xf32>
    %100 = arith.addf %98, %99 : vector<8x512xf32>
    %101 = vector.extract_strided_slice %100 {offsets = [0, 0], sizes = [8, 128], strides = [1, 1]} : vector<8x512xf32> to vector<8x128xf32>
    %102 = arith.negf %101 : vector<8x128xf32>
    %103 = math.exp %102 : vector<8x128xf32>
    %cst_27 = arith.constant 1.000000e+00 : f32
    %104 = vector.broadcast %cst_27 : f32 to vector<8x128xf32>
    %105 = arith.addf %104, %103 : vector<8x128xf32>
    %106 = arith.divf %104, %105 : vector<8x128xf32>
    %107 = vector.extract_strided_slice %100 {offsets = [0, 128], sizes = [8, 128], strides = [1, 1]} : vector<8x512xf32> to vector<8x128xf32>
    %108 = arith.negf %107 : vector<8x128xf32>
    %109 = math.exp %108 : vector<8x128xf32>
    %cst_28 = arith.constant 1.000000e+00 : f32
    %110 = vector.broadcast %cst_28 : f32 to vector<8x128xf32>
    %111 = arith.addf %110, %109 : vector<8x128xf32>
    %112 = arith.divf %110, %111 : vector<8x128xf32>
    %113 = vector.extract_strided_slice %100 {offsets = [0, 256], sizes = [8, 128], strides = [1, 1]} : vector<8x512xf32> to vector<8x128xf32>
    %114 = math.tanh %113 : vector<8x128xf32>
    %115 = vector.extract_strided_slice %100 {offsets = [0, 384], sizes = [8, 128], strides = [1, 1]} : vector<8x512xf32> to vector<8x128xf32>
    %116 = arith.negf %115 : vector<8x128xf32>
    %117 = math.exp %116 : vector<8x128xf32>
    %cst_29 = arith.constant 1.000000e+00 : f32
    %118 = vector.broadcast %cst_29 : f32 to vector<8x128xf32>
    %119 = arith.addf %118, %117 : vector<8x128xf32>
    %120 = arith.divf %118, %119 : vector<8x128xf32>
    %121 = arith.mulf %112, %93 : vector<8x128xf32>
    %122 = arith.mulf %106, %114 : vector<8x128xf32>
    %123 = arith.addf %121, %122 : vector<8x128xf32>
    %124 = math.tanh %123 : vector<8x128xf32>
    %125 = arith.mulf %120, %124 : vector<8x128xf32>
    %c4_i32 = arith.constant 4 : i32
    %126 = arith.index_cast %c4_i32 : i32 to index
    %c0_30 = arith.constant 0 : index
    %c0_31 = arith.constant 0 : index
    %127 = vector.load %arg2[%126, %c0_30, %c0_31] : memref<8x8x512xf32, #tpu.memory_space<vmem>>, vector<1x8x512xf32>
    %128 = vector.shape_cast %127 : vector<1x8x512xf32> to vector<8x512xf32>
    %cst_32 = arith.constant dense<0.000000e+00> : vector<8x512xf32>
    %129 = tpu.matmul %125, %3, %cst_32 {dimension_numbers = #tpu.dot_dimension_numbers<[1], [0], [0], [1], [0, 0, 1, 1], [], []>} : vector<8x128xf32>, vector<128x512xf32>, vector<8x512xf32> -> vector<8x512xf32>
    %130 = arith.addf %128, %129 : vector<8x512xf32>
    %131 = vector.extract_strided_slice %130 {offsets = [0, 0], sizes = [8, 128], strides = [1, 1]} : vector<8x512xf32> to vector<8x128xf32>
    %132 = arith.negf %131 : vector<8x128xf32>
    %133 = math.exp %132 : vector<8x128xf32>
    %cst_33 = arith.constant 1.000000e+00 : f32
    %134 = vector.broadcast %cst_33 : f32 to vector<8x128xf32>
    %135 = arith.addf %134, %133 : vector<8x128xf32>
    %136 = arith.divf %134, %135 : vector<8x128xf32>
    %137 = vector.extract_strided_slice %130 {offsets = [0, 128], sizes = [8, 128], strides = [1, 1]} : vector<8x512xf32> to vector<8x128xf32>
    %138 = arith.negf %137 : vector<8x128xf32>
    %139 = math.exp %138 : vector<8x128xf32>
    %cst_34 = arith.constant 1.000000e+00 : f32
    %140 = vector.broadcast %cst_34 : f32 to vector<8x128xf32>
    %141 = arith.addf %140, %139 : vector<8x128xf32>
    %142 = arith.divf %140, %141 : vector<8x128xf32>
    %143 = vector.extract_strided_slice %130 {offsets = [0, 256], sizes = [8, 128], strides = [1, 1]} : vector<8x512xf32> to vector<8x128xf32>
    %144 = math.tanh %143 : vector<8x128xf32>
    %145 = vector.extract_strided_slice %130 {offsets = [0, 384], sizes = [8, 128], strides = [1, 1]} : vector<8x512xf32> to vector<8x128xf32>
    %146 = arith.negf %145 : vector<8x128xf32>
    %147 = math.exp %146 : vector<8x128xf32>
    %cst_35 = arith.constant 1.000000e+00 : f32
    %148 = vector.broadcast %cst_35 : f32 to vector<8x128xf32>
    %149 = arith.addf %148, %147 : vector<8x128xf32>
    %150 = arith.divf %148, %149 : vector<8x128xf32>
    %151 = arith.mulf %142, %123 : vector<8x128xf32>
    %152 = arith.mulf %136, %144 : vector<8x128xf32>
    %153 = arith.addf %151, %152 : vector<8x128xf32>
    %154 = math.tanh %153 : vector<8x128xf32>
    %155 = arith.mulf %150, %154 : vector<8x128xf32>
    %c5_i32 = arith.constant 5 : i32
    %156 = arith.index_cast %c5_i32 : i32 to index
    %c0_36 = arith.constant 0 : index
    %c0_37 = arith.constant 0 : index
    %157 = vector.load %arg2[%156, %c0_36, %c0_37] : memref<8x8x512xf32, #tpu.memory_space<vmem>>, vector<1x8x512xf32>
    %158 = vector.shape_cast %157 : vector<1x8x512xf32> to vector<8x512xf32>
    %cst_38 = arith.constant dense<0.000000e+00> : vector<8x512xf32>
    %159 = tpu.matmul %155, %3, %cst_38 {dimension_numbers = #tpu.dot_dimension_numbers<[1], [0], [0], [1], [0, 0, 1, 1], [], []>} : vector<8x128xf32>, vector<128x512xf32>, vector<8x512xf32> -> vector<8x512xf32>
    %160 = arith.addf %158, %159 : vector<8x512xf32>
    %161 = vector.extract_strided_slice %160 {offsets = [0, 0], sizes = [8, 128], strides = [1, 1]} : vector<8x512xf32> to vector<8x128xf32>
    %162 = arith.negf %161 : vector<8x128xf32>
    %163 = math.exp %162 : vector<8x128xf32>
    %cst_39 = arith.constant 1.000000e+00 : f32
    %164 = vector.broadcast %cst_39 : f32 to vector<8x128xf32>
    %165 = arith.addf %164, %163 : vector<8x128xf32>
    %166 = arith.divf %164, %165 : vector<8x128xf32>
    %167 = vector.extract_strided_slice %160 {offsets = [0, 128], sizes = [8, 128], strides = [1, 1]} : vector<8x512xf32> to vector<8x128xf32>
    %168 = arith.negf %167 : vector<8x128xf32>
    %169 = math.exp %168 : vector<8x128xf32>
    %cst_40 = arith.constant 1.000000e+00 : f32
    %170 = vector.broadcast %cst_40 : f32 to vector<8x128xf32>
    %171 = arith.addf %170, %169 : vector<8x128xf32>
    %172 = arith.divf %170, %171 : vector<8x128xf32>
    %173 = vector.extract_strided_slice %160 {offsets = [0, 256], sizes = [8, 128], strides = [1, 1]} : vector<8x512xf32> to vector<8x128xf32>
    %174 = math.tanh %173 : vector<8x128xf32>
    %175 = vector.extract_strided_slice %160 {offsets = [0, 384], sizes = [8, 128], strides = [1, 1]} : vector<8x512xf32> to vector<8x128xf32>
    %176 = arith.negf %175 : vector<8x128xf32>
    %177 = math.exp %176 : vector<8x128xf32>
    %cst_41 = arith.constant 1.000000e+00 : f32
    %178 = vector.broadcast %cst_41 : f32 to vector<8x128xf32>
    %179 = arith.addf %178, %177 : vector<8x128xf32>
    %180 = arith.divf %178, %179 : vector<8x128xf32>
    %181 = arith.mulf %172, %153 : vector<8x128xf32>
    %182 = arith.mulf %166, %174 : vector<8x128xf32>
    %183 = arith.addf %181, %182 : vector<8x128xf32>
    %184 = math.tanh %183 : vector<8x128xf32>
    %185 = arith.mulf %180, %184 : vector<8x128xf32>
    %c6_i32 = arith.constant 6 : i32
    %186 = arith.index_cast %c6_i32 : i32 to index
    %c0_42 = arith.constant 0 : index
    %c0_43 = arith.constant 0 : index
    %187 = vector.load %arg2[%186, %c0_42, %c0_43] : memref<8x8x512xf32, #tpu.memory_space<vmem>>, vector<1x8x512xf32>
    %188 = vector.shape_cast %187 : vector<1x8x512xf32> to vector<8x512xf32>
    %cst_44 = arith.constant dense<0.000000e+00> : vector<8x512xf32>
    %189 = tpu.matmul %185, %3, %cst_44 {dimension_numbers = #tpu.dot_dimension_numbers<[1], [0], [0], [1], [0, 0, 1, 1], [], []>} : vector<8x128xf32>, vector<128x512xf32>, vector<8x512xf32> -> vector<8x512xf32>
    %190 = arith.addf %188, %189 : vector<8x512xf32>
    %191 = vector.extract_strided_slice %190 {offsets = [0, 0], sizes = [8, 128], strides = [1, 1]} : vector<8x512xf32> to vector<8x128xf32>
    %192 = arith.negf %191 : vector<8x128xf32>
    %193 = math.exp %192 : vector<8x128xf32>
    %cst_45 = arith.constant 1.000000e+00 : f32
    %194 = vector.broadcast %cst_45 : f32 to vector<8x128xf32>
    %195 = arith.addf %194, %193 : vector<8x128xf32>
    %196 = arith.divf %194, %195 : vector<8x128xf32>
    %197 = vector.extract_strided_slice %190 {offsets = [0, 128], sizes = [8, 128], strides = [1, 1]} : vector<8x512xf32> to vector<8x128xf32>
    %198 = arith.negf %197 : vector<8x128xf32>
    %199 = math.exp %198 : vector<8x128xf32>
    %cst_46 = arith.constant 1.000000e+00 : f32
    %200 = vector.broadcast %cst_46 : f32 to vector<8x128xf32>
    %201 = arith.addf %200, %199 : vector<8x128xf32>
    %202 = arith.divf %200, %201 : vector<8x128xf32>
    %203 = vector.extract_strided_slice %190 {offsets = [0, 256], sizes = [8, 128], strides = [1, 1]} : vector<8x512xf32> to vector<8x128xf32>
    %204 = math.tanh %203 : vector<8x128xf32>
    %205 = vector.extract_strided_slice %190 {offsets = [0, 384], sizes = [8, 128], strides = [1, 1]} : vector<8x512xf32> to vector<8x128xf32>
    %206 = arith.negf %205 : vector<8x128xf32>
    %207 = math.exp %206 : vector<8x128xf32>
    %cst_47 = arith.constant 1.000000e+00 : f32
    %208 = vector.broadcast %cst_47 : f32 to vector<8x128xf32>
    %209 = arith.addf %208, %207 : vector<8x128xf32>
    %210 = arith.divf %208, %209 : vector<8x128xf32>
    %211 = arith.mulf %202, %183 : vector<8x128xf32>
    %212 = arith.mulf %196, %204 : vector<8x128xf32>
    %213 = arith.addf %211, %212 : vector<8x128xf32>
    %214 = math.tanh %213 : vector<8x128xf32>
    %215 = arith.mulf %210, %214 : vector<8x128xf32>
    %c7_i32 = arith.constant 7 : i32
    %216 = arith.index_cast %c7_i32 : i32 to index
    %c0_48 = arith.constant 0 : index
    %c0_49 = arith.constant 0 : index
    %217 = vector.load %arg2[%216, %c0_48, %c0_49] : memref<8x8x512xf32, #tpu.memory_space<vmem>>, vector<1x8x512xf32>
    %218 = vector.shape_cast %217 : vector<1x8x512xf32> to vector<8x512xf32>
    %cst_50 = arith.constant dense<0.000000e+00> : vector<8x512xf32>
    %219 = tpu.matmul %215, %3, %cst_50 {dimension_numbers = #tpu.dot_dimension_numbers<[1], [0], [0], [1], [0, 0, 1, 1], [], []>} : vector<8x128xf32>, vector<128x512xf32>, vector<8x512xf32> -> vector<8x512xf32>
    %220 = arith.addf %218, %219 : vector<8x512xf32>
    %221 = vector.extract_strided_slice %220 {offsets = [0, 0], sizes = [8, 128], strides = [1, 1]} : vector<8x512xf32> to vector<8x128xf32>
    %222 = arith.negf %221 : vector<8x128xf32>
    %223 = math.exp %222 : vector<8x128xf32>
    %cst_51 = arith.constant 1.000000e+00 : f32
    %224 = vector.broadcast %cst_51 : f32 to vector<8x128xf32>
    %225 = arith.addf %224, %223 : vector<8x128xf32>
    %226 = arith.divf %224, %225 : vector<8x128xf32>
    %227 = vector.extract_strided_slice %220 {offsets = [0, 128], sizes = [8, 128], strides = [1, 1]} : vector<8x512xf32> to vector<8x128xf32>
    %228 = arith.negf %227 : vector<8x128xf32>
    %229 = math.exp %228 : vector<8x128xf32>
    %cst_52 = arith.constant 1.000000e+00 : f32
    %230 = vector.broadcast %cst_52 : f32 to vector<8x128xf32>
    %231 = arith.addf %230, %229 : vector<8x128xf32>
    %232 = arith.divf %230, %231 : vector<8x128xf32>
    %233 = vector.extract_strided_slice %220 {offsets = [0, 256], sizes = [8, 128], strides = [1, 1]} : vector<8x512xf32> to vector<8x128xf32>
    %234 = math.tanh %233 : vector<8x128xf32>
    %235 = vector.extract_strided_slice %220 {offsets = [0, 384], sizes = [8, 128], strides = [1, 1]} : vector<8x512xf32> to vector<8x128xf32>
    %236 = arith.negf %235 : vector<8x128xf32>
    %237 = math.exp %236 : vector<8x128xf32>
    %cst_53 = arith.constant 1.000000e+00 : f32
    %238 = vector.broadcast %cst_53 : f32 to vector<8x128xf32>
    %239 = arith.addf %238, %237 : vector<8x128xf32>
    %240 = arith.divf %238, %239 : vector<8x128xf32>
    %241 = arith.mulf %232, %213 : vector<8x128xf32>
    %242 = arith.mulf %226, %234 : vector<8x128xf32>
    %243 = arith.addf %241, %242 : vector<8x128xf32>
    %244 = math.tanh %243 : vector<8x128xf32>
    %245 = arith.mulf %240, %244 : vector<8x128xf32>
    %c8_i32 = arith.constant 8 : i32
    %c0_54 = arith.constant 0 : index
    %c0_55 = arith.constant 0 : index
    %246 = vector.load %arg7[%c0_54, %c0_55] : memref<8x128xf32, #tpu.memory_space<vmem>>, vector<8x128xf32>
    tpu.vector_store %arg7[%c0_54, %c0_55], %245 {strides = array<i32>} : memref<8x128xf32, #tpu.memory_space<vmem>>, vector<8x128xf32>,
    %c0_56 = arith.constant 0 : index
    %c0_57 = arith.constant 0 : index
    %247 = vector.load %arg8[%c0_56, %c0_57] : memref<8x128xf32, #tpu.memory_space<vmem>>, vector<8x128xf32>
    tpu.vector_store %arg8[%c0_56, %c0_57], %243 {strides = array<i32>} : memref<8x128xf32, #tpu.memory_space<vmem>>, vector<8x128xf32>,
    %c0_i32_58 = arith.constant 0 : i32
    %248 = arith.cmpi eq, %arg1, %c0_i32_58 : i32
    %249 = arith.extui %248 : i1 to i32
    %c0_i32_59 = arith.constant 0 : i32
    %250 = arith.cmpi ne, %249, %c0_i32_59 : i32
    scf.if %250 {
      %c0_60 = arith.constant 0 : index
      %c0_61 = arith.constant 0 : index
      %251 = vector.load %arg4[%c0_60, %c0_61] : memref<128x128xf32, #tpu.memory_space<vmem>>, vector<128x128xf32>
      %cst_62 = arith.constant dense<0.000000e+00> : vector<8x128xf32>
      %252 = tpu.matmul %245, %251, %cst_62 {dimension_numbers = #tpu.dot_dimension_numbers<[1], [0], [0], [1], [0, 0, 1, 1], [], []>} : vector<8x128xf32>, vector<128x128xf32>, vector<8x128xf32> -> vector<8x128xf32>
      %c0_63 = arith.constant 0 : index
      %c0_64 = arith.constant 0 : index
      %253 = vector.load %arg5[%c0_63, %c0_64] : memref<1x128xf32, #tpu.memory_space<vmem>>, vector<1x128xf32>
      %254 = vector.broadcast %253 : vector<1x128xf32> to vector<8x128xf32>
      %255 = arith.addf %252, %254 : vector<8x128xf32>
      %c0_65 = arith.constant 0 : index
      %c0_66 = arith.constant 0 : index
      %256 = vector.load %arg6[%c0_65, %c0_66] : memref<8x128xf32, #tpu.memory_space<vmem>>, vector<8x128xf32>
      tpu.vector_store %arg6[%c0_65, %c0_66], %255 {strides = array<i32>} : memref<8x128xf32, #tpu.memory_space<vmem>>, vector<8x128xf32>,
    } else {
    }
    return
  }
  func.func @transform_0(%arg0: i32, %arg1: i32) -> (i32, i32, i32) {
    %c0_i32 = arith.constant 0 : i32
    %c0_i32_0 = arith.constant 0 : i32
    return %arg1, %arg0, %c0_i32 : i32, i32, i32
  }
  func.func @transform_1(%arg0: i32, %arg1: i32) -> (i32, i32) {
    %c0_i32 = arith.constant 0 : i32
    %c0_i32_0 = arith.constant 0 : i32
    %c0_i32_1 = arith.constant 0 : i32
    return %c0_i32, %c0_i32_0 : i32, i32
  }
  func.func @transform_2(%arg0: i32, %arg1: i32) -> (i32, i32) {
    %c0_i32 = arith.constant 0 : i32
    %c0_i32_0 = arith.constant 0 : i32
    %c0_i32_1 = arith.constant 0 : i32
    return %c0_i32, %c0_i32_0 : i32, i32
  }
  func.func @transform_3(%arg0: i32, %arg1: i32) -> (i32, i32) {
    %c0_i32 = arith.constant 0 : i32
    %c0_i32_0 = arith.constant 0 : i32
    %c0_i32_1 = arith.constant 0 : i32
    return %c0_i32, %c0_i32_0 : i32, i32
  }
  func.func @transform_4(%arg0: i32, %arg1: i32) -> (i32, i32) {
    %c0_i32 = arith.constant 0 : i32
    %c0_i32_0 = arith.constant 0 : i32
    return %arg0, %c0_i32 : i32, i32
  }
}

</mosaic_0001>

<bundles_post_ra>
// kernel: tpu_custom_call.1
= control target key start
LH: loop header
LB: loop body
LE: loop exit
PB: predicated region body
PF: predicated region fallthrough
CT: control target
= control target key end

     0   :  { %9 = vsyncpa [#allocation5], 0  ;;  %s2952_s0 = inlined_call_operand.hbm [shape: f32[8,8,512], index: 0, kind: input, shape index: {}]   ;;  %s2953_s1 = inlined_call_operand.hbm [shape: f32[128,512], index: 1, kind: input, shape index: {}]   ;;  %s2954_s2 = inlined_call_operand.hbm [shape: f32[128,128], index: 2, kind: input, shape index: {}]   ;;  %s2955_s3 = inlined_call_operand.vmem [shape: f32[1,128], index: 3, kind: input, shape index: {}]   ;;  %s2956_s4 = inlined_call_operand.hbm [shape: f32[8,128], index: 4, kind: output, shape index: {}]  }
   0x1   :  { %10 = vsyncpa [#allocation8], 0 }
   0x2   :  { %11 = vsyncpa [#allocation6], 0  ;;  %s2491_s15 = smov [#allocation7]   ;;  %s2492_s17 = smov [#allocation4]  }
   0x3   :  { %s29_s16 = sshll.u32 %s2491_s15, 4  ;;  %s17_s18 = sshll.u32 %s2492_s17, 4  ;;  %s30_s16 = int_to_ptr.vmem [resolvable:$true] %s29_s16  ;;  %s2527_s18 = int_to_ptr.vmem [resolvable:$true] %s17_s18 }
   0x4   :  { %s2397_s21 = scalar_lea.hbm %s2953_s1, 8192 }
   0x5   :  { %p2398_p0 = scmp.ne.s32.totalorder %s2953_s1, %s2397_s21  ;;  %p2401_p1 = scmp.lt.u32.totalorder %s2397_s21, %s2953_s1 }
   0x7   :  { %p2403_p2 = pnand %p2401_p1, %p2398_p0 }
   0x9   :  { %2406 = shalt.err (!%p2403_p2)
}
   0xa   :  { %s2407_s26 = scalar_lea.vmem %s30_s16, 8192  ;;  %p2412_p4 = scmp.lt.s32.totalorder %s30_s16, %s30_s16 }
   0xb   :  { %p2408_p3 = scmp.ne.s32.totalorder %s30_s16, %s2407_s26  ;;  %p2413_p5 = scmp.lt.s32.totalorder %s2407_s26, %s2407_s26 }
   0xd   :  { %p2414_p6 = por %p2413_p5, %p2412_p4 }
   0xf   :  { %p2415_p7 = pnand %p2414_p6, %p2408_p3 }
  0x11   :  { %2418 = shalt.err (!%p2415_p7)
}
  0x12   :  { %s2493_s27 = smov 512   ;;  %s2494_s28 = smov 32  }
  0x13   :  { %35 = dma.hbm_to_vmem [thread:$0]  %s2953_s1, 8192, %s30_s16, [#allocation8], %s2493_s27, %s2493_s27, %s2494_s28  }
  0x14   :  { %s2419_s7 = scalar_lea.hbm %s2952_s0, 4096 }
  0x15   :  { %p2420_p8 = scmp.ne.s32.totalorder %s2952_s0, %s2419_s7  ;;  %p2423_p9 = scmp.lt.u32.totalorder %s2419_s7, %s2952_s0 }
  0x17   :  { %p2425_p10 = pnand %p2423_p9, %p2420_p8 }
  0x19   :  { %2428 = shalt.err (!%p2425_p10)
}
  0x1a   :  { %s2429_s12 = scalar_lea.vmem %s2527_s18, 4096  ;;  %p2434_p12 = scmp.lt.s32.totalorder %s2527_s18, %s2527_s18 }
  0x1b   :  { %p2430_p11 = scmp.ne.s32.totalorder %s2527_s18, %s2429_s12  ;;  %p2435_p13 = scmp.lt.s32.totalorder %s2429_s12, %s2429_s12 }
  0x1d   :  { %p2436_p0 = por %p2435_p13, %p2434_p12 }
  0x1f   :  { %p2437_p1 = pnand %p2436_p0, %p2430_p11 }
  0x21   :  { %2440 = shalt.err (!%p2437_p1)
}
  0x22   :  { %23 = dma.hbm_to_vmem [thread:$0]  %s2952_s0, 4096, %s2527_s18, [#allocation5], %s2493_s27, %s2493_s27, %s2494_s28  }
  0x23   :  { %s2495_s14 = smov [#allocation9]   ;;  %s2441_s19 = scalar_lea.hbm %s2954_s2, 2048 }
  0x24   :  { %s41_s15 = sshll.u32 %s2495_s14, 4  ;;  %p2442_p2 = scmp.ne.s32.totalorder %s2954_s2, %s2441_s19  ;;  %s42_s15 = int_to_ptr.vmem [resolvable:$true] %s41_s15 }
  0x25   :  { %p2445_p3 = scmp.lt.u32.totalorder %s2441_s19, %s2954_s2 }
  0x27   :  { %p2447_p4 = pnand %p2445_p3, %p2442_p2 }
  0x29   :  { %2450 = shalt.err (!%p2447_p4)
}
  0x2a   :  { %s2451_s24 = scalar_lea.vmem %s42_s15, 2048  ;;  %p2456_p6 = scmp.lt.s32.totalorder %s42_s15, %s42_s15 }
  0x2b   :  { %p2452_p5 = scmp.ne.s32.totalorder %s42_s15, %s2451_s24  ;;  %p2457_p7 = scmp.lt.s32.totalorder %s2451_s24, %s2451_s24 }
  0x2d   :  { %p2458_p8 = por %p2457_p7, %p2456_p6 }
  0x2f   :  { %p2459_p9 = pnand %p2458_p8, %p2452_p5 }
  0x31   :  { %2462 = shalt.err (!%p2459_p9)
}
  0x32   :  { %s2496_s0 = smov 128   ;;  %s2497_s18 = smov 8  }
  0x33   :  { %47 = dma.hbm_to_vmem [thread:$0]  %s2954_s2, 2048, %s42_s15, [#allocation8], %s2496_s0, %s2496_s0, %s2497_s18  }
  0x34   :  { %2485 = dma.done.wait [#allocation5], 4096  }
  0x35   :  { %2486 = vsyncadd [#allocation5], 4294963200 }
  0x36   :  { %2487 = dma.done.wait [#allocation8], 10240  }
  0x37   :  { %2488 = vsyncadd [#allocation8], 4294957056  ;;  %v2498_v0 = vmov 0.0   ;;  %v66_v1 = vld [vmem:[#allocation7 + $0x8] sm:$0xff]  ;;  %v65_v3 = vld [vmem:[#allocation7] sm:$0xff]  ;;  %vm2500_vm0 = vmmov 0  }
  0x38   :  { %199 = vmatprep.mubr.f32.mxu0 %v2498_v0  ;;  %270 = vmatprep.mubr.f32.mxu1 %v2498_v0  ;;  %v70_v2 = vld [vmem:[#allocation7 + $0x28] sm:$0xff]  ;;  %v69_v5 = vld [vmem:[#allocation7 + $0x20] sm:$0xff]  ;;  %v68_v19 = vld [vmem:[#allocation7 + $0x18] sm:$0xff]  ;;  %s2501_s28 = smov [#allocation10]  }
  0x39   :  { %v2572_v4 = vpack.c.bf16 %v70_v2, %v66_v1  ;;  %v74_v6 = vld [vmem:[#allocation7 + $0x48] sm:$0xff]  ;;  %v2574_v8 = vpack.c.bf16 %v69_v5, %v65_v3  ;;  %v73_v10 = vld [vmem:[#allocation7 + $0x40] sm:$0xff]  ;;  %v72_v20 = vld [vmem:[#allocation7 + $0x38] sm:$0xff]  ;;  %s1635_s29 = sshll.u32 %s2501_s28, 4  ;;  %s1636_s29 = int_to_ptr.vmem [resolvable:$true] %s1635_s29 }
  0x3a   :  { %v78_v7 = vld [vmem:[#allocation7 + $0x68] sm:$0xff]  ;;  %v77_v11 = vld [vmem:[#allocation7 + $0x60] sm:$0xff]  ;;  %v2585_v22 = vpack.c.bf16 %v72_v20, %v68_v19  ;;  %v67_v23 = vld [vmem:[#allocation7 + $0x10] sm:$0xff]  ;;  %s2463_s30 = scalar_lea.vmem %s1636_s29, 128  ;;  %p2468_p11 = scmp.lt.s32.totalorder %s1636_s29, %s1636_s29 }
  0x3b   :  { %v2576_v9 = vpack.c.bf16 %v78_v7, %v74_v6  ;;  %v82_v12 = vld [vmem:[#allocation7 + $0x88] sm:$0xff]  ;;  %1723 = vmatprep.subr.bf16.mxu0 %v2572_v4  ;;  %v2580_v14 = vpack.c.bf16 %v77_v11, %v73_v10  ;;  %v81_v15 = vld [vmem:[#allocation7 + $0x80] sm:$0xff]  ;;  %v71_v24 = vld [vmem:[#allocation7 + $0x30] sm:$0xff]  ;;  %p2464_p10 = scmp.ne.s32.totalorder %s1636_s29, %s2463_s30  ;;  %p2469_p12 = scmp.lt.s32.totalorder %s2463_s30, %s2463_s30 }
  0x3c   :  { %v86_v13 = vld [vmem:[#allocation7 + $0xa8] sm:$0xff]  ;;  %1725 = vmatpush1.bf16.msra.mxu0 %v2574_v8  ;;  %v85_v16 = vld [vmem:[#allocation7 + $0xa0] sm:$0xff]  ;;  %v2587_v25 = vpack.c.bf16 %v71_v24, %v67_v23  ;;  %1755 = vmatprep.subr.bf16.mxu1 %v2585_v22  ;;  %v76_v27 = vld [vmem:[#allocation7 + $0x58] sm:$0xff] }
  0x3d   :  { %1727 = vmatprep.subr.bf16.mxu0 %v2576_v9  ;;  %v2583_v17 = vpack.c.bf16 %v86_v13, %v82_v12  ;;  %v90_v18 = vld [vmem:[#allocation7 + $0xc8] sm:$0xff]  ;;  %v2590_v26 = vpack.c.bf16 %v85_v16, %v81_v15  ;;  %v80_v28 = vld [vmem:[#allocation7 + $0x78] sm:$0xff]  ;;  %v75_v29 = vld [vmem:[#allocation7 + $0x50] sm:$0xff]  ;;  %p2470_p13 = por %p2469_p12, %p2468_p11 }
  0x3e   :  { %v94_v21 = vld [vmem:[#allocation7 + $0xe8] sm:$0xff]  ;;  %v89_v31 = vld [vmem:[#allocation7 + $0xc0] sm:$0xff]  ;;  %1757 = vmatpush1.bf16.msra.mxu1 %v2587_v25  ;;  %v2597_v33 = vpack.c.bf16 %v80_v28, %v76_v27  ;;  %v79_v34 = vld [vmem:[#allocation7 + $0x70] sm:$0xff] }
  0x3f   :  { %v2594_v30 = vpack.c.bf16 %v94_v21, %v90_v18  ;;  %v93_v32 = vld [vmem:[#allocation7 + $0xe0] sm:$0xff]  ;;  %v98_v35 = vld [vmem:[#allocation7 + $0x108] sm:$0xff]  ;;  %v2599_v37 = vpack.c.bf16 %v79_v34, %v75_v29  ;;  %v84_v38 = vld [vmem:[#allocation7 + $0x98] sm:$0xff]  ;;  %p2471_p0 = pnand %p2470_p13, %p2464_p10 }
  0x40   :  { %1729 = vmatpush1.bf16.msra.mxu0 %v2580_v14  ;;  %v102_v36 = vld [vmem:[#allocation7 + $0x128] sm:$0xff]  ;;  %1759 = vmatprep.subr.bf16.mxu1 %v2597_v33  ;;  %v88_v39 = vld [vmem:[#allocation7 + $0xb8] sm:$0xff]  ;;  %v83_v40 = vld [vmem:[#allocation7 + $0x90] sm:$0xff]  ;;  %v2603_v42 = vpack.c.bf16 %v93_v32, %v89_v31 }
  0x41   :  { %1731 = vmatprep.subr.bf16.mxu0 %v2583_v17  ;;  %v87_v41 = vld [vmem:[#allocation7 + $0xb0] sm:$0xff]  ;;  %v97_v43 = vld [vmem:[#allocation7 + $0x100] sm:$0xff]  ;;  %v2605_v45 = vpack.c.bf16 %v88_v39, %v84_v38  ;;  %v2608_v46 = vpack.c.bf16 %v102_v36, %v98_v35  ;;  %v106_v47 = vld [vmem:[#allocation7 + $0x148] sm:$0xff] }
  0x42   :  { %v101_v44 = vld [vmem:[#allocation7 + $0x120] sm:$0xff]  ;;  %1761 = vmatpush1.bf16.msra.mxu1 %v2599_v37  ;;  %v2611_v48 = vpack.c.bf16 %v87_v41, %v83_v40  ;;  %v92_v49 = vld [vmem:[#allocation7 + $0xd8] sm:$0xff]  ;;  %v110_v51 = vld [vmem:[#allocation7 + $0x168] sm:$0xff] }
  0x43   :  { %v96_v50 = vld [vmem:[#allocation7 + $0xf8] sm:$0xff]  ;;  %1763 = vmatprep.subr.bf16.mxu1 %v2605_v45  ;;  %v91_v53 = vld [vmem:[#allocation7 + $0xd0] sm:$0xff]  ;;  %v2617_v55 = vpack.c.bf16 %v101_v44, %v97_v43  ;;  %v2620_v58 = vpack.c.bf16 %v110_v51, %v106_v47  ;;  %v105_v59 = vld [vmem:[#allocation7 + $0x140] sm:$0xff] }
  0x44   :  { %1733 = vmatpush1.bf16.msra.mxu0 %v2590_v26  ;;  %v2614_v52 = vpack.c.bf16 %v96_v50, %v92_v49  ;;  %v95_v54 = vld [vmem:[#allocation7 + $0xf0] sm:$0xff]  ;;  %v100_v56 = vld [vmem:[#allocation7 + $0x118] sm:$0xff]  ;;  %v109_v60 = vld [vmem:[#allocation7 + $0x160] sm:$0xff] }
  0x45   :  { %1735 = vmatprep.subr.bf16.mxu0 %v2594_v30  ;;  %v104_v57 = vld [vmem:[#allocation7 + $0x138] sm:$0xff]  ;;  %v114_v61 = vld [vmem:[#allocation7 + $0x188] sm:$0xff]  ;;  %v2623_v62 = vpack.c.bf16 %v95_v54, %v91_v53  ;;  %v99_v2 = vld [vmem:[#allocation7 + $0x110] sm:$0xff]  ;;  %v2629_v7 = vpack.c.bf16 %v109_v60, %v105_v59 }
  0x46   :  { %1765 = vmatpush1.bf16.msra.mxu1 %v2611_v48  ;;  %v118_v63 = vld [vmem:[#allocation7 + $0x1a8] sm:$0xff]  ;;  %v2626_v1 = vpack.c.bf16 %v104_v57, %v100_v56  ;;  %v103_v3 = vld [vmem:[#allocation7 + $0x130] sm:$0xff]  ;;  %v108_v5 = vld [vmem:[#allocation7 + $0x158] sm:$0xff] }
  0x47   :  { %1767 = vmatprep.subr.bf16.mxu1 %v2614_v52  ;;  %v112_v6 = vld [vmem:[#allocation7 + $0x178] sm:$0xff]  ;;  %v2632_v10 = vpack.c.bf16 %v118_v63, %v114_v61  ;;  %v113_v11 = vld [vmem:[#allocation7 + $0x180] sm:$0xff]  ;;  %v122_v13 = vld [vmem:[#allocation7 + $0x1c8] sm:$0xff]  ;;  %v2635_v15 = vpack.c.bf16 %v103_v3, %v99_v2 }
  0x48   :  { %1737 = vmatpush1.bf16.msra.mxu0 %v2603_v42  ;;  %v117_v12 = vld [vmem:[#allocation7 + $0x1a0] sm:$0xff]  ;;  %v126_v16 = vld [vmem:[#allocation7 + $0x1e8] sm:$0xff]  ;;  %v2638_v18 = vpack.c.bf16 %v112_v6, %v108_v5  ;;  %v107_v19 = vld [vmem:[#allocation7 + $0x150] sm:$0xff] }
  0x49   :  { %1739 = vmatprep.subr.bf16.mxu0 %v2608_v46  ;;  %v111_v20 = vld [vmem:[#allocation7 + $0x170] sm:$0xff]  ;;  %v116_v21 = vld [vmem:[#allocation7 + $0x198] sm:$0xff]  ;;  %v2641_v24 = vpack.c.bf16 %v117_v12, %v113_v11  ;;  %v2644_v27 = vpack.c.bf16 %v126_v16, %v122_v13  ;;  %v121_v28 = vld [vmem:[#allocation7 + $0x1c0] sm:$0xff] }
  0x4a   :  { %1769 = vmatpush1.bf16.msra.mxu1 %v2623_v62  ;;  %v120_v23 = vld [vmem:[#allocation7 + $0x1b8] sm:$0xff]  ;;  %v125_v29 = vld [vmem:[#allocation7 + $0x1e0] sm:$0xff]  ;;  %v2647_v31 = vpack.c.bf16 %v111_v20, %v107_v19  ;;  %v115_v34 = vld [vmem:[#allocation7 + $0x190] sm:$0xff] }
  0x4b   :  { %1771 = vmatprep.subr.bf16.mxu1 %v2626_v1  ;;  %v2650_v32 = vpack.c.bf16 %v120_v23, %v116_v21  ;;  %v119_v35 = vld [vmem:[#allocation7 + $0x1b0] sm:$0xff]  ;;  %v124_v36 = vld [vmem:[#allocation7 + $0x1d8] sm:$0xff]  ;;  %v2653_v39 = vpack.c.bf16 %v125_v29, %v121_v28  ;;  %v131_v49 = vld [vmem:[#allocation4] sm:$0xff] }
  0x4c   :  { %1741 = vmatpush1.bf16.msra.mxu0 %v2617_v55  ;;  %v128_v38 = vld [vmem:[#allocation7 + $0x1f8] sm:$0xff]  ;;  %v2657_v40 = vpack.c.bf16 %v119_v35, %v115_v34  ;;  %v123_v43 = vld [vmem:[#allocation7 + $0x1d0] sm:$0xff]  ;;  %v132_v50 = vld [vmem:[#allocation4 + $0x8] sm:$0xff] }
  0x4d   :  { %1743 = vmatprep.subr.bf16.mxu0 %v2620_v58  ;;  %v2660_v41 = vpack.c.bf16 %v128_v38, %v124_v36  ;;  %v127_v44 = vld [vmem:[#allocation7 + $0x1f0] sm:$0xff]  ;;  %v134_v60 = vld [vmem:[#allocation4 + $0x18] sm:$0xff] }
  0x4e   :  { %1773 = vmatpush1.bf16.msra.mxu1 %v2635_v15  ;;  %v2664_v47 = vpack.c.bf16 %v127_v44, %v123_v43  ;;  %v133_v3 = vld [vmem:[#allocation4 + $0x10] sm:$0xff]  ;;  %v306_v44 = vld [vmem:[#allocation4 + $0x20] sm:$0xff] }
  0x4f   :  { %1775 = vmatprep.subr.bf16.mxu1 %v2638_v18 }
  0x50   :  { %1745 = vmatpush1.bf16.msra.mxu0 %v2629_v7 }
  0x51   :  { %1747 = vmatprep.subr.bf16.mxu0 %v2632_v10 }
  0x52   :  { %1777 = vmatpush1.bf16.msra.mxu1 %v2647_v31 }
  0x53   :  { %1779 = vmatprep.subr.bf16.mxu1 %v2650_v32 }
  0x54   :  { %1749 = vmatpush1.bf16.msra.mxu0 %v2641_v24 }
  0x55   :  { %1751 = vmatprep.subr.bf16.mxu0 %v2644_v27 }
  0x56   :  { %1781 = vmatpush1.bf16.msra.mxu1 %v2657_v40 }
  0x57   :  { %1783 = vmatprep.subr.bf16.mxu1 %v2660_v41 }
  0x58   :  { %1753 = vmatpush1.bf16.msra.mxu0 %v2653_v39 }
  0x59   :  { %1787 = vmatprep.subr.bf16.mxu0 %v2572_v4 }
  0x5a   :  { %1785 = vmatpush1.bf16.msra.mxu1 %v2664_v47 }
  0x5b   :  { %200 = vmatmul.mubr.f32.vlgmr.msra.gmra.mrb[0].mxu0 %v2498_v0  ;;  %1819 = vmatprep.subr.bf16.mxu1 %v2585_v22 }
  0x5c   :  { %1789 = vmatpush1.bf16.msra.mxu0 %v2574_v8  ;;  %374 = vmatprep.mubr.f32.mxu0 %v2498_v0 }
  0x5d   :  { %1791 = vmatprep.subr.bf16.mxu0 %v2576_v9  ;;  %271 = vmatmul.mubr.f32.vlgmr.msra.gmra.mrb[0].mxu1 %v2498_v0 }
  0x5e   :  { %1821 = vmatpush1.bf16.msra.mxu1 %v2587_v25  ;;  %445 = vmatprep.mubr.f32.mxu1 %v2498_v0 }
  0x5f   :  { %1823 = vmatprep.subr.bf16.mxu1 %v2597_v33 }
  0x60   :  { %1793 = vmatpush1.bf16.msra.mxu0 %v2580_v14 }
  0x61   :  { %1795 = vmatprep.subr.bf16.mxu0 %v2583_v17 }
  0x62   :  { %1825 = vmatpush1.bf16.msra.mxu1 %v2599_v37 }
  0x63   :  { %1827 = vmatprep.subr.bf16.mxu1 %v2605_v45 }
  0x64   :  { %1797 = vmatpush1.bf16.msra.mxu0 %v2590_v26 }
  0x65   :  { %1799 = vmatprep.subr.bf16.mxu0 %v2594_v30 }
  0x66   :  { %1829 = vmatpush1.bf16.msra.mxu1 %v2611_v48 }
  0x67   :  { %1831 = vmatprep.subr.bf16.mxu1 %v2614_v52 }
  0x68   :  { %1801 = vmatpush1.bf16.msra.mxu0 %v2603_v42 }
  0x69   :  { %1803 = vmatprep.subr.bf16.mxu0 %v2608_v46 }
  0x6a   :  { %1833 = vmatpush1.bf16.msra.mxu1 %v2623_v62 }
  0x6b   :  { %1835 = vmatprep.subr.bf16.mxu1 %v2626_v1 }
  0x6c   :  { %1805 = vmatpush1.bf16.msra.mxu0 %v2617_v55 }
  0x6d   :  { %1807 = vmatprep.subr.bf16.mxu0 %v2620_v58 }
  0x6e   :  { %1837 = vmatpush1.bf16.msra.mxu1 %v2635_v15 }
  0x6f   :  { %1839 = vmatprep.subr.bf16.mxu1 %v2638_v18 }
  0x70   :  { %1809 = vmatpush1.bf16.msra.mxu0 %v2629_v7 }
  0x71   :  { %1811 = vmatprep.subr.bf16.mxu0 %v2632_v10 }
  0x72   :  { %1841 = vmatpush1.bf16.msra.mxu1 %v2647_v31 }
  0x73   :  { %1843 = vmatprep.subr.bf16.mxu1 %v2650_v32 }
  0x74   :  { %1813 = vmatpush1.bf16.msra.mxu0 %v2641_v24 }
  0x75   :  { %1815 = vmatprep.subr.bf16.mxu0 %v2644_v27 }
  0x76   :  { %1845 = vmatpush1.bf16.msra.mxu1 %v2657_v40 }
  0x77   :  { %1847 = vmatprep.subr.bf16.mxu1 %v2660_v41 }
  0x78   :  { %1817 = vmatpush1.bf16.msra.mxu0 %v2653_v39 }
  0x79   :  { %1851 = vmatprep.subr.bf16.mxu0 %v2572_v4 }
  0x7a   :  { %1849 = vmatpush1.bf16.msra.mxu1 %v2664_v47 }
  0x7b   :  { %1883 = vmatprep.subr.bf16.mxu1 %v2585_v22 }
 0x12e   :  { %v201_v51 = vpop.f32.mrb[0].mxu0 }
 0x12f   :  { %v277_v53 = vadd.f32 %v201_v51, %v131_v49  ;;  %v203_v54 = vpop.f32.mrb[1].mxu0  ;;  %v307_v49 = vld [vmem:[#allocation4 + $0x28] sm:$0xff] }
 0x130   :  { %v278_v56 = vadd.f32 %v203_v54, %v132_v50  ;;  %v272_v61 = vpop.f32.mrb[0].mxu1 }
 0x131   :  { %v1645_v57 = vmul.f32 -1.442695, %v277_v53  ;;  %v274_v63 = vpop.f32.mrb[1].mxu1  ;;  %v279_v6 = vadd.f32 %v272_v61, %v133_v3  ;;  %v309_v61 = vld [vmem:[#allocation4 + $0x38] sm:$0xff] }
 0x132   :  { %v1646_v59 = vmul.f32 -1.442695, %v278_v56  ;;  %v280_v2 = vadd.f32 %v274_v63, %v134_v60 }
 0x133   :  { %2269 = vpow2.f32 %v1645_v57 }
 0x134   :  { %2271 = vpow2.f32 %v1646_v59  ;;  %v1647_v5 = vmul.f32 -1.442695, %v280_v2  ;;  %v308_v2 = vld [vmem:[#allocation4 + $0x30] sm:$0xff] }
 0x136   :  { %2273 = vpow2.f32 %v1647_v5 }
 0x137   :  { %2275 = vtanh.f32 %v279_v6 }
 0x13d   :  { %v2270_v11 = vpop.eup %2269 }
 0x13e   :  { %v2272_v12 = vpop.eup %2271  ;;  %v284_v13 = vadd.f32 1.0, %v2270_v11 }
 0x13f   :  { %v290_v16 = vadd.f32 1.0, %v2272_v12 }
 0x140   :  { %2277 = vrcp.f32 %v284_v13  ;;  %v2274_v19 = vpop.eup %2273 }
 0x141   :  { %2279 = vrcp.f32 %v290_v16  ;;  %v2276_v20 = vpop.eup %2275  ;;  %v297_v23 = vadd.f32 1.0, %v2274_v19 }
 0x143   :  { %2281 = vrcp.f32 %v297_v23 }
 0x14a   :  { %v2278_v21 = vpop.eup %2277 }
 0x14b   :  { %v2280_v28 = vpop.eup %2279  ;;  %v301_v29 = vmul.f32 %v2278_v21, %v2276_v20 }
 0x14c   :  { %v300_v34 = vmul.f32 0.0, %v2280_v28 }
 0x14d   :  { %v2282_v36 = vpop.eup %2281 }
 0x14e   :  { %v2706_v35 = vadd.f32 %v301_v29, %v300_v34 }
 0x150   :  { %2283 = vtanh.f32 %v2706_v35 }
 0x15a   :  { %v2284_v38 = vpop.eup %2283 }
 0x15b   :  { %v304_v43 = vmul.f32 %v2284_v38, %v2282_v36 }
 0x15d   :  { %375 = vmatmul.mubr.f32.vlgmr.msra.gmra.mrb[2].mxu0 %v304_v43  ;;  %446 = vmatmul.mubr.f32.vlgmr.msra.gmra.mrb[2].mxu1 %v304_v43 }
 0x15e   :  { %1853 = vmatpush1.bf16.msra.mxu0 %v2574_v8  ;;  %1885 = vmatpush1.bf16.msra.mxu1 %v2587_v25 }
 0x15f   :  { %1855 = vmatprep.subr.bf16.mxu0 %v2576_v9  ;;  %1887 = vmatprep.subr.bf16.mxu1 %v2597_v33 }
 0x160   :  { %549 = vmatprep.mubr.f32.mxu0 %v2498_v0  ;;  %620 = vmatprep.mubr.f32.mxu1 %v2498_v0 }
 0x162   :  { %1857 = vmatpush1.bf16.msra.mxu0 %v2580_v14  ;;  %1889 = vmatpush1.bf16.msra.mxu1 %v2599_v37 }
 0x163   :  { %1859 = vmatprep.subr.bf16.mxu0 %v2583_v17  ;;  %1891 = vmatprep.subr.bf16.mxu1 %v2605_v45 }
 0x166   :  { %1861 = vmatpush1.bf16.msra.mxu0 %v2590_v26  ;;  %1893 = vmatpush1.bf16.msra.mxu1 %v2611_v48 }
 0x167   :  { %1863 = vmatprep.subr.bf16.mxu0 %v2594_v30  ;;  %1895 = vmatprep.subr.bf16.mxu1 %v2614_v52 }
 0x16a   :  { %1865 = vmatpush1.bf16.msra.mxu0 %v2603_v42  ;;  %1897 = vmatpush1.bf16.msra.mxu1 %v2623_v62 }
 0x16b   :  { %1867 = vmatprep.subr.bf16.mxu0 %v2608_v46  ;;  %1899 = vmatprep.subr.bf16.mxu1 %v2626_v1 }
 0x16e   :  { %1869 = vmatpush1.bf16.msra.mxu0 %v2617_v55  ;;  %1901 = vmatpush1.bf16.msra.mxu1 %v2635_v15 }
 0x16f   :  { %1871 = vmatprep.subr.bf16.mxu0 %v2620_v58  ;;  %1903 = vmatprep.subr.bf16.mxu1 %v2638_v18 }
 0x172   :  { %1873 = vmatpush1.bf16.msra.mxu0 %v2629_v7  ;;  %1905 = vmatpush1.bf16.msra.mxu1 %v2647_v31 }
 0x173   :  { %1875 = vmatprep.subr.bf16.mxu0 %v2632_v10  ;;  %1907 = vmatprep.subr.bf16.mxu1 %v2650_v32 }
 0x176   :  { %1877 = vmatpush1.bf16.msra.mxu0 %v2641_v24  ;;  %1909 = vmatpush1.bf16.msra.mxu1 %v2657_v40 }
 0x177   :  { %1879 = vmatprep.subr.bf16.mxu0 %v2644_v27  ;;  %1911 = vmatprep.subr.bf16.mxu1 %v2660_v41 }
 0x17a   :  { %1881 = vmatpush1.bf16.msra.mxu0 %v2653_v39  ;;  %1913 = vmatpush1.bf16.msra.mxu1 %v2664_v47 }
 0x17b   :  { %1915 = vmatprep.subr.bf16.mxu0 %v2572_v4  ;;  %1947 = vmatprep.subr.bf16.mxu1 %v2585_v22 }
 0x230   :  { %v376_v50 = vpop.f32.mrb[2].mxu0  ;;  %v447_v51 = vpop.f32.mrb[2].mxu1 }
 0x231   :  { %v452_v53 = vadd.f32 %v376_v50, %v306_v44  ;;  %v378_v54 = vpop.f32.mrb[3].mxu0  ;;  %v449_v56 = vpop.f32.mrb[3].mxu1  ;;  %v454_v5 = vadd.f32 %v447_v51, %v308_v2  ;;  %v482_v44 = vld [vmem:[#allocation4 + $0x48] sm:$0xff] }
 0x232   :  { %v453_v57 = vadd.f32 %v378_v54, %v307_v49  ;;  %v455_v63 = vadd.f32 %v449_v56, %v309_v61 }
 0x233   :  { %v1648_v59 = vmul.f32 -1.442695, %v452_v53 }
 0x234   :  { %v1649_v60 = vmul.f32 -1.442695, %v453_v57  ;;  %v1650_v3 = vmul.f32 -1.442695, %v455_v63  ;;  %v483_v63 = vld [vmem:[#allocation4 + $0x50] sm:$0xff] }
 0x235   :  { %2285 = vpow2.f32 %v1648_v59 }
 0x236   :  { %2287 = vpow2.f32 %v1649_v60  ;;  %v484_v60 = vld [vmem:[#allocation4 + $0x58] sm:$0xff] }
 0x237   :  { %2289 = vpow2.f32 %v1650_v3 }
 0x238   :  { %2291 = vtanh.f32 %v454_v5 }
 0x23f   :  { %v2286_v6 = vpop.eup %2285 }
 0x240   :  { %v2288_v11 = vpop.eup %2287  ;;  %v459_v12 = vadd.f32 1.0, %v2286_v6 }
 0x241   :  { %v465_v13 = vadd.f32 1.0, %v2288_v11  ;;  %v2290_v16 = vpop.eup %2289 }
 0x242   :  { %2293 = vrcp.f32 %v459_v12  ;;  %v2292_v19 = vpop.eup %2291  ;;  %v472_v28 = vadd.f32 1.0, %v2290_v16 }
 0x243   :  { %2295 = vrcp.f32 %v465_v13 }
 0x244   :  { %2297 = vrcp.f32 %v472_v28 }
 0x24c   :  { %v2294_v20 = vpop.eup %2293 }
 0x24d   :  { %v2296_v21 = vpop.eup %2295  ;;  %v476_v23 = vmul.f32 %v2294_v20, %v2292_v19 }
 0x24e   :  { %v475_v29 = vmul.f32 %v2296_v21, %v2706_v35  ;;  %v2298_v36 = vpop.eup %2297  ;;  %v481_v35 = vld [vmem:[#allocation4 + $0x40] sm:$0xff] }
 0x250   :  { %v2744_v34 = vadd.f32 %v476_v23, %v475_v29 }
 0x252   :  { %2299 = vtanh.f32 %v2744_v34 }
 0x25c   :  { %v2300_v38 = vpop.eup %2299 }
 0x25d   :  { %v479_v43 = vmul.f32 %v2300_v38, %v2298_v36 }
 0x25f   :  { %550 = vmatmul.mubr.f32.vlgmr.msra.gmra.mrb[4].mxu0 %v479_v43  ;;  %621 = vmatmul.mubr.f32.vlgmr.msra.gmra.mrb[4].mxu1 %v479_v43 }
 0x260   :  { %1917 = vmatpush1.bf16.msra.mxu0 %v2574_v8  ;;  %1949 = vmatpush1.bf16.msra.mxu1 %v2587_v25 }
 0x261   :  { %1919 = vmatprep.subr.bf16.mxu0 %v2576_v9  ;;  %1951 = vmatprep.subr.bf16.mxu1 %v2597_v33 }
 0x262   :  { %724 = vmatprep.mubr.f32.mxu0 %v2498_v0  ;;  %795 = vmatprep.mubr.f32.mxu1 %v2498_v0 }
 0x264   :  { %1921 = vmatpush1.bf16.msra.mxu0 %v2580_v14  ;;  %1953 = vmatpush1.bf16.msra.mxu1 %v2599_v37 }
 0x265   :  { %1923 = vmatprep.subr.bf16.mxu0 %v2583_v17  ;;  %1955 = vmatprep.subr.bf16.mxu1 %v2605_v45 }
 0x268   :  { %1925 = vmatpush1.bf16.msra.mxu0 %v2590_v26  ;;  %1957 = vmatpush1.bf16.msra.mxu1 %v2611_v48 }
 0x269   :  { %1927 = vmatprep.subr.bf16.mxu0 %v2594_v30  ;;  %1959 = vmatprep.subr.bf16.mxu1 %v2614_v52 }
 0x26c   :  { %1929 = vmatpush1.bf16.msra.mxu0 %v2603_v42  ;;  %1961 = vmatpush1.bf16.msra.mxu1 %v2623_v62 }
 0x26d   :  { %1931 = vmatprep.subr.bf16.mxu0 %v2608_v46  ;;  %1963 = vmatprep.subr.bf16.mxu1 %v2626_v1 }
 0x270   :  { %1933 = vmatpush1.bf16.msra.mxu0 %v2617_v55  ;;  %1965 = vmatpush1.bf16.msra.mxu1 %v2635_v15 }
 0x271   :  { %1935 = vmatprep.subr.bf16.mxu0 %v2620_v58  ;;  %1967 = vmatprep.subr.bf16.mxu1 %v2638_v18 }
 0x274   :  { %1937 = vmatpush1.bf16.msra.mxu0 %v2629_v7  ;;  %1969 = vmatpush1.bf16.msra.mxu1 %v2647_v31 }
 0x275   :  { %1939 = vmatprep.subr.bf16.mxu0 %v2632_v10  ;;  %1971 = vmatprep.subr.bf16.mxu1 %v2650_v32 }
 0x278   :  { %1941 = vmatpush1.bf16.msra.mxu0 %v2641_v24  ;;  %1973 = vmatpush1.bf16.msra.mxu1 %v2657_v40 }
 0x279   :  { %1943 = vmatprep.subr.bf16.mxu0 %v2644_v27  ;;  %1975 = vmatprep.subr.bf16.mxu1 %v2660_v41 }
 0x27c   :  { %1945 = vmatpush1.bf16.msra.mxu0 %v2653_v39  ;;  %1977 = vmatpush1.bf16.msra.mxu1 %v2664_v47 }
 0x27d   :  { %1979 = vmatprep.subr.bf16.mxu0 %v2572_v4  ;;  %2011 = vmatprep.subr.bf16.mxu1 %v2585_v22 }
 0x332   :  { %v551_v49 = vpop.f32.mrb[4].mxu0  ;;  %v622_v50 = vpop.f32.mrb[4].mxu1 }
 0x333   :  { %v627_v51 = vadd.f32 %v551_v49, %v481_v35  ;;  %v553_v53 = vpop.f32.mrb[5].mxu0  ;;  %v624_v54 = vpop.f32.mrb[5].mxu1  ;;  %v629_v3 = vadd.f32 %v622_v50, %v483_v63  ;;  %v657_v35 = vld [vmem:[#allocation4 + $0x68] sm:$0xff] }
 0x334   :  { %v628_v56 = vadd.f32 %v553_v53, %v482_v44  ;;  %v630_v61 = vadd.f32 %v624_v54, %v484_v60 }
 0x335   :  { %v1651_v57 = vmul.f32 -1.442695, %v627_v51 }
 0x336   :  { %v1652_v59 = vmul.f32 -1.442695, %v628_v56  ;;  %v1653_v2 = vmul.f32 -1.442695, %v630_v61  ;;  %v658_v61 = vld [vmem:[#allocation4 + $0x70] sm:$0xff] }
 0x337   :  { %2301 = vpow2.f32 %v1651_v57 }
 0x338   :  { %2303 = vpow2.f32 %v1652_v59  ;;  %v659_v59 = vld [vmem:[#allocation4 + $0x78] sm:$0xff] }
 0x339   :  { %2305 = vpow2.f32 %v1653_v2 }
 0x33a   :  { %2307 = vtanh.f32 %v629_v3 }
 0x341   :  { %v2302_v5 = vpop.eup %2301 }
 0x342   :  { %v2304_v6 = vpop.eup %2303  ;;  %v634_v11 = vadd.f32 1.0, %v2302_v5 }
 0x343   :  { %v640_v12 = vadd.f32 1.0, %v2304_v6  ;;  %v2306_v13 = vpop.eup %2305 }
 0x344   :  { %2309 = vrcp.f32 %v634_v11  ;;  %v2308_v16 = vpop.eup %2307  ;;  %v647_v23 = vadd.f32 1.0, %v2306_v13 }
 0x345   :  { %2311 = vrcp.f32 %v640_v12 }
 0x346   :  { %2313 = vrcp.f32 %v647_v23 }
 0x34e   :  { %v2310_v19 = vpop.eup %2309 }
 0x34f   :  { %v2312_v20 = vpop.eup %2311  ;;  %v651_v21 = vmul.f32 %v2310_v19, %v2308_v16 }
 0x350   :  { %v650_v28 = vmul.f32 %v2312_v20, %v2744_v34  ;;  %v2314_v36 = vpop.eup %2313  ;;  %v656_v34 = vld [vmem:[#allocation4 + $0x60] sm:$0xff] }
 0x352   :  { %v2782_v29 = vadd.f32 %v651_v21, %v650_v28 }
 0x354   :  { %2315 = vtanh.f32 %v2782_v29 }
 0x35e   :  { %v2316_v38 = vpop.eup %2315 }
 0x35f   :  { %v654_v43 = vmul.f32 %v2316_v38, %v2314_v36 }
 0x361   :  { %725 = vmatmul.mubr.f32.vlgmr.msra.gmra.mrb[6].mxu0 %v654_v43  ;;  %796 = vmatmul.mubr.f32.vlgmr.msra.gmra.mrb[6].mxu1 %v654_v43 }
 0x362   :  { %1981 = vmatpush1.bf16.msra.mxu0 %v2574_v8  ;;  %2013 = vmatpush1.bf16.msra.mxu1 %v2587_v25 }
 0x363   :  { %1983 = vmatprep.subr.bf16.mxu0 %v2576_v9  ;;  %2015 = vmatprep.subr.bf16.mxu1 %v2597_v33 }
 0x364   :  { %899 = vmatprep.mubr.f32.mxu0 %v2498_v0  ;;  %970 = vmatprep.mubr.f32.mxu1 %v2498_v0 }
 0x366   :  { %1985 = vmatpush1.bf16.msra.mxu0 %v2580_v14  ;;  %2017 = vmatpush1.bf16.msra.mxu1 %v2599_v37 }
 0x367   :  { %1987 = vmatprep.subr.bf16.mxu0 %v2583_v17  ;;  %2019 = vmatprep.subr.bf16.mxu1 %v2605_v45 }
 0x36a   :  { %1989 = vmatpush1.bf16.msra.mxu0 %v2590_v26  ;;  %2021 = vmatpush1.bf16.msra.mxu1 %v2611_v48 }
 0x36b   :  { %1991 = vmatprep.subr.bf16.mxu0 %v2594_v30  ;;  %2023 = vmatprep.subr.bf16.mxu1 %v2614_v52 }
 0x36e   :  { %1993 = vmatpush1.bf16.msra.mxu0 %v2603_v42  ;;  %2025 = vmatpush1.bf16.msra.mxu1 %v2623_v62 }
 0x36f   :  { %1995 = vmatprep.subr.bf16.mxu0 %v2608_v46  ;;  %2027 = vmatprep.subr.bf16.mxu1 %v2626_v1 }
 0x372   :  { %1997 = vmatpush1.bf16.msra.mxu0 %v2617_v55  ;;  %2029 = vmatpush1.bf16.msra.mxu1 %v2635_v15 }
 0x373   :  { %1999 = vmatprep.subr.bf16.mxu0 %v2620_v58  ;;  %2031 = vmatprep.subr.bf16.mxu1 %v2638_v18 }
 0x376   :  { %2001 = vmatpush1.bf16.msra.mxu0 %v2629_v7  ;;  %2033 = vmatpush1.bf16.msra.mxu1 %v2647_v31 }
 0x377   :  { %2003 = vmatprep.subr.bf16.mxu0 %v2632_v10  ;;  %2035 = vmatprep.subr.bf16.mxu1 %v2650_v32 }
 0x37a   :  { %2005 = vmatpush1.bf16.msra.mxu0 %v2641_v24  ;;  %2037 = vmatpush1.bf16.msra.mxu1 %v2657_v40 }
 0x37b   :  { %2007 = vmatprep.subr.bf16.mxu0 %v2644_v27  ;;  %2039 = vmatprep.subr.bf16.mxu1 %v2660_v41 }
 0x37e   :  { %2009 = vmatpush1.bf16.msra.mxu0 %v2653_v39  ;;  %2041 = vmatpush1.bf16.msra.mxu1 %v2664_v47 }
 0x37f   :  { %2043 = vmatprep.subr.bf16.mxu0 %v2572_v4  ;;  %2075 = vmatprep.subr.bf16.mxu1 %v2585_v22 }
 0x434   :  { %v726_v44 = vpop.f32.mrb[6].mxu0  ;;  %v797_v49 = vpop.f32.mrb[6].mxu1 }
 0x435   :  { %v802_v50 = vadd.f32 %v726_v44, %v656_v34  ;;  %v728_v51 = vpop.f32.mrb[7].mxu0  ;;  %v799_v53 = vpop.f32.mrb[7].mxu1  ;;  %v804_v2 = vadd.f32 %v797_v49, %v658_v61  ;;  %v832_v34 = vld [vmem:[#allocation4 + $0x88] sm:$0xff] }
 0x436   :  { %v803_v54 = vadd.f32 %v728_v51, %v657_v35  ;;  %v805_v60 = vadd.f32 %v799_v53, %v659_v59 }
 0x437   :  { %v1654_v56 = vmul.f32 -1.442695, %v802_v50 }
 0x438   :  { %v1655_v57 = vmul.f32 -1.442695, %v803_v54  ;;  %v1656_v63 = vmul.f32 -1.442695, %v805_v60  ;;  %v833_v60 = vld [vmem:[#allocation4 + $0x90] sm:$0xff] }
 0x439   :  { %2317 = vpow2.f32 %v1654_v56 }
 0x43a   :  { %2319 = vpow2.f32 %v1655_v57  ;;  %v834_v57 = vld [vmem:[#allocation4 + $0x98] sm:$0xff] }
 0x43b   :  { %2321 = vpow2.f32 %v1656_v63 }
 0x43c   :  { %2323 = vtanh.f32 %v804_v2 }
 0x443   :  { %v2318_v3 = vpop.eup %2317 }
 0x444   :  { %v2320_v5 = vpop.eup %2319  ;;  %v809_v6 = vadd.f32 1.0, %v2318_v3 }
 0x445   :  { %v815_v11 = vadd.f32 1.0, %v2320_v5  ;;  %v2322_v12 = vpop.eup %2321 }
 0x446   :  { %2325 = vrcp.f32 %v809_v6  ;;  %v2324_v13 = vpop.eup %2323  ;;  %v822_v21 = vadd.f32 1.0, %v2322_v12 }
 0x447   :  { %2327 = vrcp.f32 %v815_v11 }
 0x448   :  { %2329 = vrcp.f32 %v822_v21 }
 0x450   :  { %v2326_v16 = vpop.eup %2325 }
 0x451   :  { %v2328_v19 = vpop.eup %2327  ;;  %v826_v20 = vmul.f32 %v2326_v16, %v2324_v13 }
 0x452   :  { %v825_v23 = vmul.f32 %v2328_v19, %v2782_v29  ;;  %v2330_v36 = vpop.eup %2329  ;;  %v831_v29 = vld [vmem:[#allocation4 + $0x80] sm:$0xff] }
 0x454   :  { %v2820_v28 = vadd.f32 %v826_v20, %v825_v23 }
 0x456   :  { %2331 = vtanh.f32 %v2820_v28 }
 0x460   :  { %v2332_v38 = vpop.eup %2331 }
 0x461   :  { %v829_v43 = vmul.f32 %v2332_v38, %v2330_v36 }
 0x463   :  { %900 = vmatmul.mubr.f32.vlgmr.msra.gmra.mrb[8].mxu0 %v829_v43  ;;  %971 = vmatmul.mubr.f32.vlgmr.msra.gmra.mrb[8].mxu1 %v829_v43 }
 0x464   :  { %2045 = vmatpush1.bf16.msra.mxu0 %v2574_v8  ;;  %2077 = vmatpush1.bf16.msra.mxu1 %v2587_v25 }
 0x465   :  { %2047 = vmatprep.subr.bf16.mxu0 %v2576_v9  ;;  %2079 = vmatprep.subr.bf16.mxu1 %v2597_v33 }
 0x466   :  { %1074 = vmatprep.mubr.f32.mxu0 %v2498_v0  ;;  %1145 = vmatprep.mubr.f32.mxu1 %v2498_v0 }
 0x468   :  { %2049 = vmatpush1.bf16.msra.mxu0 %v2580_v14  ;;  %2081 = vmatpush1.bf16.msra.mxu1 %v2599_v37 }
 0x469   :  { %2051 = vmatprep.subr.bf16.mxu0 %v2583_v17  ;;  %2083 = vmatprep.subr.bf16.mxu1 %v2605_v45 }
 0x46c   :  { %2053 = vmatpush1.bf16.msra.mxu0 %v2590_v26  ;;  %2085 = vmatpush1.bf16.msra.mxu1 %v2611_v48 }
 0x46d   :  { %2055 = vmatprep.subr.bf16.mxu0 %v2594_v30  ;;  %2087 = vmatprep.subr.bf16.mxu1 %v2614_v52 }
 0x470   :  { %2057 = vmatpush1.bf16.msra.mxu0 %v2603_v42  ;;  %2089 = vmatpush1.bf16.msra.mxu1 %v2623_v62 }
 0x471   :  { %2059 = vmatprep.subr.bf16.mxu0 %v2608_v46  ;;  %2091 = vmatprep.subr.bf16.mxu1 %v2626_v1 }
 0x474   :  { %2061 = vmatpush1.bf16.msra.mxu0 %v2617_v55  ;;  %2093 = vmatpush1.bf16.msra.mxu1 %v2635_v15 }
 0x475   :  { %2063 = vmatprep.subr.bf16.mxu0 %v2620_v58  ;;  %2095 = vmatprep.subr.bf16.mxu1 %v2638_v18 }
 0x478   :  { %2065 = vmatpush1.bf16.msra.mxu0 %v2629_v7  ;;  %2097 = vmatpush1.bf16.msra.mxu1 %v2647_v31 }
 0x479   :  { %2067 = vmatprep.subr.bf16.mxu0 %v2632_v10  ;;  %2099 = vmatprep.subr.bf16.mxu1 %v2650_v32 }
 0x47c   :  { %2069 = vmatpush1.bf16.msra.mxu0 %v2641_v24  ;;  %2101 = vmatpush1.bf16.msra.mxu1 %v2657_v40 }
 0x47d   :  { %2071 = vmatprep.subr.bf16.mxu0 %v2644_v27  ;;  %2103 = vmatprep.subr.bf16.mxu1 %v2660_v41 }
 0x480   :  { %2073 = vmatpush1.bf16.msra.mxu0 %v2653_v39  ;;  %2105 = vmatpush1.bf16.msra.mxu1 %v2664_v47 }
 0x481   :  { %2107 = vmatprep.subr.bf16.mxu0 %v2572_v4  ;;  %2139 = vmatprep.subr.bf16.mxu1 %v2585_v22 }
 0x536   :  { %v901_v35 = vpop.f32.mrb[8].mxu0  ;;  %v972_v44 = vpop.f32.mrb[8].mxu1 }
 0x537   :  { %v977_v49 = vadd.f32 %v901_v35, %v831_v29  ;;  %v903_v50 = vpop.f32.mrb[9].mxu0  ;;  %v974_v51 = vpop.f32.mrb[9].mxu1  ;;  %v979_v63 = vadd.f32 %v972_v44, %v833_v60  ;;  %v1007_v29 = vld [vmem:[#allocation4 + $0xa8] sm:$0xff] }
 0x538   :  { %v978_v53 = vadd.f32 %v903_v50, %v832_v34  ;;  %v980_v59 = vadd.f32 %v974_v51, %v834_v57 }
 0x539   :  { %v1657_v54 = vmul.f32 -1.442695, %v977_v49 }
 0x53a   :  { %v1658_v56 = vmul.f32 -1.442695, %v978_v53  ;;  %v1659_v61 = vmul.f32 -1.442695, %v980_v59  ;;  %v1008_v59 = vld [vmem:[#allocation4 + $0xb0] sm:$0xff] }
 0x53b   :  { %2333 = vpow2.f32 %v1657_v54 }
 0x53c   :  { %2335 = vpow2.f32 %v1658_v56  ;;  %v1009_v56 = vld [vmem:[#allocation4 + $0xb8] sm:$0xff] }
 0x53d   :  { %2337 = vpow2.f32 %v1659_v61 }
 0x53e   :  { %2339 = vtanh.f32 %v979_v63 }
 0x545   :  { %v2334_v2 = vpop.eup %2333 }
 0x546   :  { %v2336_v3 = vpop.eup %2335  ;;  %v984_v5 = vadd.f32 1.0, %v2334_v2 }
 0x547   :  { %v990_v6 = vadd.f32 1.0, %v2336_v3  ;;  %v2338_v11 = vpop.eup %2337 }
 0x548   :  { %2341 = vrcp.f32 %v984_v5  ;;  %v2340_v12 = vpop.eup %2339  ;;  %v997_v20 = vadd.f32 1.0, %v2338_v11 }
 0x549   :  { %2343 = vrcp.f32 %v990_v6 }
 0x54a   :  { %2345 = vrcp.f32 %v997_v20 }
 0x552   :  { %v2342_v13 = vpop.eup %2341 }
 0x553   :  { %v2344_v16 = vpop.eup %2343  ;;  %v1001_v19 = vmul.f32 %v2342_v13, %v2340_v12 }
 0x554   :  { %v1000_v21 = vmul.f32 %v2344_v16, %v2820_v28  ;;  %v2346_v36 = vpop.eup %2345  ;;  %v1006_v28 = vld [vmem:[#allocation4 + $0xa0] sm:$0xff] }
 0x556   :  { %v2858_v23 = vadd.f32 %v1001_v19, %v1000_v21 }
 0x558   :  { %2347 = vtanh.f32 %v2858_v23 }
 0x562   :  { %v2348_v38 = vpop.eup %2347 }
 0x563   :  { %v1004_v43 = vmul.f32 %v2348_v38, %v2346_v36  ;;  %v1536_v38 = vld [vmem:[#allocation9 + $0x8] sm:$0xff] }
 0x565   :  { %1075 = vmatmul.mubr.f32.vlgmr.msra.gmra.mrb[10].mxu0 %v1004_v43  ;;  %1146 = vmatmul.mubr.f32.vlgmr.msra.gmra.mrb[10].mxu1 %v1004_v43 }
 0x566   :  { %2109 = vmatpush1.bf16.msra.mxu0 %v2574_v8  ;;  %2141 = vmatpush1.bf16.msra.mxu1 %v2587_v25 }
 0x567   :  { %2111 = vmatprep.subr.bf16.mxu0 %v2576_v9  ;;  %2143 = vmatprep.subr.bf16.mxu1 %v2597_v33 }
 0x568   :  { %1249 = vmatprep.mubr.f32.mxu0 %v2498_v0  ;;  %1320 = vmatprep.mubr.f32.mxu1 %v2498_v0 }
 0x56a   :  { %2113 = vmatpush1.bf16.msra.mxu0 %v2580_v14  ;;  %2145 = vmatpush1.bf16.msra.mxu1 %v2599_v37 }
 0x56b   :  { %2115 = vmatprep.subr.bf16.mxu0 %v2583_v17  ;;  %2147 = vmatprep.subr.bf16.mxu1 %v2605_v45 }
 0x56e   :  { %2117 = vmatpush1.bf16.msra.mxu0 %v2590_v26  ;;  %2149 = vmatpush1.bf16.msra.mxu1 %v2611_v48 }
 0x56f   :  { %2119 = vmatprep.subr.bf16.mxu0 %v2594_v30  ;;  %2151 = vmatprep.subr.bf16.mxu1 %v2614_v52 }
 0x572   :  { %2121 = vmatpush1.bf16.msra.mxu0 %v2603_v42  ;;  %2153 = vmatpush1.bf16.msra.mxu1 %v2623_v62 }
 0x573   :  { %2123 = vmatprep.subr.bf16.mxu0 %v2608_v46  ;;  %2155 = vmatprep.subr.bf16.mxu1 %v2626_v1 }
 0x576   :  { %2125 = vmatpush1.bf16.msra.mxu0 %v2617_v55  ;;  %2157 = vmatpush1.bf16.msra.mxu1 %v2635_v15 }
 0x577   :  { %2127 = vmatprep.subr.bf16.mxu0 %v2620_v58  ;;  %2159 = vmatprep.subr.bf16.mxu1 %v2638_v18 }
 0x57a   :  { %2129 = vmatpush1.bf16.msra.mxu0 %v2629_v7  ;;  %2161 = vmatpush1.bf16.msra.mxu1 %v2647_v31 }
 0x57b   :  { %2131 = vmatprep.subr.bf16.mxu0 %v2632_v10  ;;  %2163 = vmatprep.subr.bf16.mxu1 %v2650_v32 }
 0x57e   :  { %2133 = vmatpush1.bf16.msra.mxu0 %v2641_v24  ;;  %2165 = vmatpush1.bf16.msra.mxu1 %v2657_v40 }
 0x57f   :  { %2135 = vmatprep.subr.bf16.mxu0 %v2644_v27  ;;  %2167 = vmatprep.subr.bf16.mxu1 %v2660_v41 }
 0x582   :  { %2137 = vmatpush1.bf16.msra.mxu0 %v2653_v39  ;;  %2169 = vmatpush1.bf16.msra.mxu1 %v2664_v47 }
 0x583   :  { %2171 = vmatprep.subr.bf16.mxu0 %v2572_v4  ;;  %2203 = vmatprep.subr.bf16.mxu1 %v2585_v22 }
 0x638   :  { %v1076_v34 = vpop.f32.mrb[10].mxu0  ;;  %v1147_v35 = vpop.f32.mrb[10].mxu1 }
 0x639   :  { %v1152_v44 = vadd.f32 %v1076_v34, %v1006_v28  ;;  %v1078_v49 = vpop.f32.mrb[11].mxu0  ;;  %v1149_v50 = vpop.f32.mrb[11].mxu1  ;;  %v1154_v61 = vadd.f32 %v1147_v35, %v1008_v59  ;;  %v2499_v28 = vmov 0.0|0.0   ;;  %v1538_v34 = vld [vmem:[#allocation9 + $0x18] sm:$0xff] }
 0x63a   :  { %v1153_v51 = vadd.f32 %v1078_v49, %v1007_v29  ;;  %v1155_v57 = vadd.f32 %v1149_v50, %v1009_v56  ;;  %v1537_v29 = vld [vmem:[#allocation9 + $0x10] sm:$0xff]  ;;  %v1540_v49 = vld [vmem:[#allocation9 + $0x28] sm:$0xff]  ;;  %v1543_v56 = vld [vmem:[#allocation9 + $0x40] sm:$0xff] }
 0x63b   :  { %v1660_v53 = vmul.f32 -1.442695, %v1152_v44  ;;  %v2238_v35 = vpack.c.bf16 %v1538_v34, %v1537_v29  ;;  %v1539_v44 = vld [vmem:[#allocation9 + $0x20] sm:$0xff] }
 0x63c   :  { %v1661_v54 = vmul.f32 -1.442695, %v1153_v51  ;;  %v1662_v60 = vmul.f32 -1.442695, %v1155_v57  ;;  %v2241_v50 = vpack.c.bf16 %v1540_v49, %v1539_v44  ;;  %v1541_v51 = vld [vmem:[#allocation9 + $0x30] sm:$0xff]  ;;  %v1544_v57 = vld [vmem:[#allocation9 + $0x48] sm:$0xff] }
 0x63d   :  { %2349 = vpow2.f32 %v1660_v53  ;;  %v1542_v53 = vld [vmem:[#allocation9 + $0x38] sm:$0xff]  ;;  %v2247_v59 = vpack.c.bf16 %v1544_v57, %v1543_v56 }
 0x63e   :  { %2351 = vpow2.f32 %v1661_v54  ;;  %v2244_v54 = vpack.c.bf16 %v1542_v53, %v1541_v51 }
 0x63f   :  { %2353 = vpow2.f32 %v1662_v60  ;;  %v1545_v60 = vld [vmem:[#allocation9 + $0x50] sm:$0xff] }
 0x640   :  { %2355 = vtanh.f32 %v1154_v61  ;;  %v1546_v61 = vld [vmem:[#allocation9 + $0x58] sm:$0xff] }
 0x647   :  { %v2350_v4 = vpop.eup %2349 }
 0x648   :  { %v2352_v63 = vpop.eup %2351  ;;  %v1159_v22 = vadd.f32 1.0, %v2350_v4  ;;  %v1547_v4 = vld [vmem:[#allocation9 + $0x60] sm:$0xff] }
 0x649   :  { %v1165_v2 = vadd.f32 1.0, %v2352_v63  ;;  %v2354_v3 = vpop.eup %2353  ;;  %v2250_v63 = vpack.c.bf16 %v1546_v61, %v1545_v60 }
 0x64a   :  { %2357 = vrcp.f32 %v1159_v22  ;;  %v2356_v5 = vpop.eup %2355  ;;  %v1172_v13 = vadd.f32 1.0, %v2354_v3  ;;  %v1548_v22 = vld [vmem:[#allocation9 + $0x68] sm:$0xff]  ;;  %v1549_v3 = vld [vmem:[#allocation9 + $0x70] sm:$0xff] }
 0x64b   :  { %2359 = vrcp.f32 %v1165_v2  ;;  %v2253_v2 = vpack.c.bf16 %v1548_v22, %v1547_v4 }
 0x64c   :  { %2361 = vrcp.f32 %v1172_v13 }
 0x654   :  { %v2358_v6 = vpop.eup %2357 }
 0x655   :  { %v2360_v11 = vpop.eup %2359  ;;  %v1176_v12 = vmul.f32 %v2358_v6, %v2356_v5  ;;  %v1550_v5 = vld [vmem:[#allocation9 + $0x78] sm:$0xff] }
 0x656   :  { %v1175_v16 = vmul.f32 %v2360_v11, %v2858_v23  ;;  %v2362_v20 = vpop.eup %2361  ;;  %v1535_v23 = vld [vmem:[#allocation9] sm:$0xff]  ;;  %v2256_v6 = vpack.c.bf16 %v1550_v5, %v1549_v3 }
 0x657   :  { %v2235_v43 = vpack.c.bf16 %v1536_v38, %v1535_v23  ;;  %v1356_v11 = vld [vmem:[#allocation4 + $0xe0] sm:$0xff] }
 0x658   :  { %v2896_v19 = vadd.f32 %v1176_v12, %v1175_v16  ;;  %v1357_v12 = vld [vmem:[#allocation4 + $0xe8] sm:$0xff] }
 0x65a   :  { %2363 = vtanh.f32 %v2896_v19 }
 0x664   :  { %v2364_v21 = vpop.eup %2363 }
 0x665   :  { %v1179_v36 = vmul.f32 %v2364_v21, %v2362_v20 }
 0x667   :  { %1250 = vmatmul.mubr.f32.vlgmr.msra.gmra.mrb[12].mxu0 %v1179_v36  ;;  %1321 = vmatmul.mubr.f32.vlgmr.msra.gmra.mrb[12].mxu1 %v1179_v36 }
 0x668   :  { %2173 = vmatpush1.bf16.msra.mxu0 %v2574_v8  ;;  %2205 = vmatpush1.bf16.msra.mxu1 %v2587_v25  ;;  %v1181_v8 = vld [vmem:[#allocation4 + $0xc0] sm:$0xff] }
 0x669   :  { %2175 = vmatprep.subr.bf16.mxu0 %v2576_v9  ;;  %2207 = vmatprep.subr.bf16.mxu1 %v2597_v33  ;;  %v1182_v9 = vld [vmem:[#allocation4 + $0xc8] sm:$0xff] }
 0x66a   :  { %1424 = vmatprep.mubr.f32.mxu0 %v2498_v0  ;;  %1495 = vmatprep.mubr.f32.mxu1 %v2498_v0 }
 0x66c   :  { %2177 = vmatpush1.bf16.msra.mxu0 %v2580_v14  ;;  %2209 = vmatpush1.bf16.msra.mxu1 %v2599_v37 }
 0x66d   :  { %2179 = vmatprep.subr.bf16.mxu0 %v2583_v17  ;;  %2211 = vmatprep.subr.bf16.mxu1 %v2605_v45  ;;  %v1184_v45 = vld [vmem:[#allocation4 + $0xd8] sm:$0xff] }
 0x670   :  { %2181 = vmatpush1.bf16.msra.mxu0 %v2590_v26  ;;  %2213 = vmatpush1.bf16.msra.mxu1 %v2611_v48  ;;  %v1183_v48 = vld [vmem:[#allocation4 + $0xd0] sm:$0xff] }
 0x671   :  { %2183 = vmatprep.subr.bf16.mxu0 %v2594_v30  ;;  %2215 = vmatprep.subr.bf16.mxu1 %v2614_v52 }
 0x674   :  { %2185 = vmatpush1.bf16.msra.mxu0 %v2603_v42  ;;  %2217 = vmatpush1.bf16.msra.mxu1 %v2623_v62 }
 0x675   :  { %2187 = vmatprep.subr.bf16.mxu0 %v2608_v46  ;;  %2219 = vmatprep.subr.bf16.mxu1 %v2626_v1 }
 0x678   :  { %2189 = vmatpush1.bf16.msra.mxu0 %v2617_v55  ;;  %2221 = vmatpush1.bf16.msra.mxu1 %v2635_v15 }
 0x679   :  { %2191 = vmatprep.subr.bf16.mxu0 %v2620_v58  ;;  %2223 = vmatprep.subr.bf16.mxu1 %v2638_v18 }
 0x67c   :  { %2193 = vmatpush1.bf16.msra.mxu0 %v2629_v7  ;;  %2225 = vmatpush1.bf16.msra.mxu1 %v2647_v31 }
 0x67d   :  { %2195 = vmatprep.subr.bf16.mxu0 %v2632_v10  ;;  %2227 = vmatprep.subr.bf16.mxu1 %v2650_v32 }
 0x680   :  { %2197 = vmatpush1.bf16.msra.mxu0 %v2641_v24  ;;  %2229 = vmatpush1.bf16.msra.mxu1 %v2657_v40 }
 0x681   :  { %2199 = vmatprep.subr.bf16.mxu0 %v2644_v27  ;;  %2231 = vmatprep.subr.bf16.mxu1 %v2660_v41 }
 0x684   :  { %2201 = vmatpush1.bf16.msra.mxu0 %v2653_v39  ;;  %2233 = vmatpush1.bf16.msra.mxu1 %v2664_v47 }
 0x685   :  { %2234 = vmatprep.subr.bf16.mxu0 %v2499_v28 }
 0x73a   :  { %v1251_v14 = vpop.f32.mrb[12].mxu0  ;;  %v1322_v17 = vpop.f32.mrb[12].mxu1 }
 0x73b   :  { %v1327_v25 = vadd.f32 %v1251_v14, %v1181_v8  ;;  %v1253_v26 = vpop.f32.mrb[13].mxu0  ;;  %v1324_v30 = vpop.f32.mrb[13].mxu1  ;;  %v1329_v55 = vadd.f32 %v1322_v17, %v1183_v48  ;;  %v1358_v17 = vld [vmem:[#allocation4 + $0xf0] sm:$0xff] }
 0x73c   :  { %v1328_v33 = vadd.f32 %v1253_v26, %v1182_v9  ;;  %v1330_v46 = vadd.f32 %v1324_v30, %v1184_v45 }
 0x73d   :  { %v1663_v37 = vmul.f32 -1.442695, %v1327_v25 }
 0x73e   :  { %v1664_v42 = vmul.f32 -1.442695, %v1328_v33  ;;  %v1665_v52 = vmul.f32 -1.442695, %v1330_v46 }
 0x73f   :  { %2365 = vpow2.f32 %v1663_v37 }
 0x740   :  { %2367 = vpow2.f32 %v1664_v42 }
 0x741   :  { %2369 = vpow2.f32 %v1665_v52 }
 0x742   :  { %2371 = vtanh.f32 %v1329_v55 }
 0x749   :  { %v2366_v58 = vpop.eup %2365 }
 0x74a   :  { %v2368_v62 = vpop.eup %2367  ;;  %v1334_v1 = vadd.f32 1.0, %v2366_v58 }
 0x74b   :  { %v1340_v7 = vadd.f32 1.0, %v2368_v62  ;;  %v2370_v10 = vpop.eup %2369 }
 0x74c   :  { %2373 = vrcp.f32 %v1334_v1  ;;  %v2372_v15 = vpop.eup %2371  ;;  %v1347_v31 = vadd.f32 1.0, %v2370_v10 }
 0x74d   :  { %2375 = vrcp.f32 %v1340_v7 }
 0x74e   :  { %2377 = vrcp.f32 %v1347_v31 }
 0x756   :  { %v2374_v18 = vpop.eup %2373 }
 0x757   :  { %v2376_v24 = vpop.eup %2375  ;;  %v1351_v27 = vmul.f32 %v2374_v18, %v2372_v15  ;;  %v1669_v18 = vld [vmem:[%s2955_s3] ss:$0 sm:$0xff] }
 0x758   :  { %v1350_v32 = vmul.f32 %v2376_v24, %v2896_v19  ;;  %v2378_v40 = vpop.eup %2377 }
 0x75a   :  { %v2932_v39 = vadd.f32 %v1351_v27, %v1350_v32 }
 0x75c   :  { %2379 = vtanh.f32 %v2932_v39 }
 0x766   :  { %v2380_v41 = vpop.eup %2379 }
 0x767   :  { %v1354_v47 = vmul.f32 %v2380_v41, %v2378_v40 }
 0x769   :  { %1425 = vmatmul.mubr.f32.vlgmr.msra.gmra.mrb[14].mxu0 %v1354_v47  ;;  %1496 = vmatmul.mubr.f32.vlgmr.msra.gmra.mrb[14].mxu1 %v1354_v47 }
 0x76a   :  { %2236 = vmatpush3.bf16.msra.mxu0 %v2235_v43  ;;  %1719 = vmatprep.mubr.msk.f32.mxu0 %vm2500_vm0, %v2498_v0  ;;  %v1359_v0 = vld [vmem:[#allocation4 + $0xf8] sm:$0xff] }
 0x76b   :  { %2237 = vmatprep.subr.bf16.mxu0 %v2499_v28 }
 0x76e   :  { %2239 = vmatpush3.bf16.msra.mxu0 %v2238_v35 }
 0x76f   :  { %2240 = vmatprep.subr.bf16.mxu0 %v2499_v28 }
 0x772   :  { %2242 = vmatpush3.bf16.msra.mxu0 %v2241_v50 }
 0x773   :  { %2243 = vmatprep.subr.bf16.mxu0 %v2499_v28 }
 0x776   :  { %2245 = vmatpush3.bf16.msra.mxu0 %v2244_v54 }
 0x777   :  { %2246 = vmatprep.subr.bf16.mxu0 %v2499_v28 }
 0x77a   :  { %2248 = vmatpush3.bf16.msra.mxu0 %v2247_v59 }
 0x77b   :  { %2249 = vmatprep.subr.bf16.mxu0 %v2499_v28 }
 0x77e   :  { %2251 = vmatpush3.bf16.msra.mxu0 %v2250_v63 }
 0x77f   :  { %2252 = vmatprep.subr.bf16.mxu0 %v2499_v28 }
 0x782   :  { %2254 = vmatpush3.bf16.msra.mxu0 %v2253_v2 }
 0x783   :  { %2255 = vmatprep.subr.bf16.mxu0 %v2499_v28 }
 0x786   :  { %2257 = vmatpush3.bf16.msra.mxu0 %v2256_v6 }
 0x83c   :  { %v1426_v13 = vpop.f32.mrb[14].mxu0  ;;  %v1497_v16 = vpop.f32.mrb[14].mxu1 }
 0x83d   :  { %v1502_v19 = vadd.f32 %v1426_v13, %v1356_v11  ;;  %v1428_v20 = vpop.f32.mrb[15].mxu0  ;;  %v1499_v21 = vpop.f32.mrb[15].mxu1  ;;  %v1504_v26 = vadd.f32 %v1497_v16, %v1358_v17 }
 0x83e   :  { %v1503_v36 = vadd.f32 %v1428_v20, %v1357_v12  ;;  %v1505_v14 = vadd.f32 %v1499_v21, %v1359_v0 }
 0x83f   :  { %v1666_v8 = vmul.f32 -1.442695, %v1502_v19 }
 0x840   :  { %v1667_v9 = vmul.f32 -1.442695, %v1503_v36  ;;  %v1668_v25 = vmul.f32 -1.442695, %v1505_v14 }
 0x841   :  { %2381 = vpow2.f32 %v1666_v8 }
 0x842   :  { %2383 = vpow2.f32 %v1667_v9 }
 0x843   :  { %2385 = vpow2.f32 %v1668_v25 }
 0x844   :  { %2387 = vtanh.f32 %v1504_v26 }
 0x84b   :  { %v2382_v30 = vpop.eup %2381 }
 0x84c   :  { %v2384_v33 = vpop.eup %2383  ;;  %v1509_v37 = vadd.f32 1.0, %v2382_v30 }
 0x84d   :  { %v1515_v42 = vadd.f32 1.0, %v2384_v33  ;;  %v2386_v45 = vpop.eup %2385 }
 0x84e   :  { %2389 = vrcp.f32 %v1509_v37  ;;  %v2388_v46 = vpop.eup %2387  ;;  %v1522_v58 = vadd.f32 1.0, %v2386_v45 }
 0x84f   :  { %2391 = vrcp.f32 %v1515_v42 }
 0x850   :  { %2393 = vrcp.f32 %v1522_v58 }
 0x858   :  { %v2390_v48 = vpop.eup %2389 }
 0x859   :  { %v2392_v52 = vpop.eup %2391  ;;  %v1526_v55 = vmul.f32 %v2390_v48, %v2388_v46 }
 0x85a   :  { %v1525_v62 = vmul.f32 %v2392_v52, %v2932_v39  ;;  %v2394_v7 = vpop.eup %2393 }
 0x85c   :  { %v1527_v1 = vadd.f32 %v1526_v55, %v1525_v62 }
 0x85e   :  { %2395 = vtanh.f32 %v1527_v1 }
 0x868   :  { %v2396_v10 = vpop.eup %2395 }
 0x869   :  { %v1529_v15 = vmul.f32 %v2396_v10, %v2394_v7 }
 0x86b   :  { %1720 = vmatmul.mubr.f32.vlgmr.msra.gmra.mrb[16].mxu0 %v1529_v15 }
 0x93e   :  { %v1624_v24 = vpop.f32.mrb[16].mxu0 }
 0x93f   :  { %v1625_v27 = vadd.f32 %v1669_v18, %v1624_v24  ;;  %v1721_v31 = vpop.f32.mrb[17].mxu0 }
 0x941   :  { %1628 = vst [vmem:[#allocation10] sm:$0xff] %v1625_v27 }
 0x942   :  { %2474 = shalt.err (!%p2471_p0)
}
 0x943   :  { %s2475_s7 = scalar_lea.hbm %s2956_s4, 128 }
 0x944   :  { %p2476_p1 = scmp.ne.s32.totalorder %s2956_s4, %s2475_s7  ;;  %p2479_p2 = scmp.lt.u32.totalorder %s2475_s7, %s2956_s4 }
 0x946   :  { %p2481_p3 = pnand %p2479_p2, %p2476_p1 }
 0x948   :  { %2484 = shalt.err (!%p2481_p3)
}
 0x949   :  { %1638 = dma.vmem_to_hbm [thread:$0]  %s1636_s29, 128, %s2956_s4, [#allocation6]  }
 0x94a   :  { %2489 = dma.done.wait [#allocation6], 128  }
 0x94b   :  { %2490 = vsyncadd [#allocation6], 4294967168 }
 0x94c   :  { %1642 = vsyncpa [#allocation5], 1 }
 0x94d   :  { %1643 = vsyncpa [#allocation8], 1 }
 0x94e   :  { %1644 = vsyncpa [#allocation6], 1 }

</bundles_post_ra>
